<compile_context>
chip_gen: v5e
topology: v5e:2x2
jax: 0.10.0
libtpu: 0.0.40
codegen_flags: <defaults>
</compile_context>

<pallas_src>
import jax
import jax.numpy as jnp
from jax import lax
from jax.experimental import pallas as pl
from jax.experimental.pallas import tpu as pltpu

# Module hyper-parameters (Bottleneck(c1=32, c2=32, shortcut=True, e=0.5)).
N, H, W = 2, 16, 16
C1 = 32
C2 = 32
E = 0.5
C_ = int(C2 * E)            # hidden channels of cv1/cv2 = 16
SHORTCUT = True
ADD = SHORTCUT and (C1 == C2)
NP = N * H * W              # flattened spatial*batch = 512 lanes


def _silu(v):
    return v * jax.nn.sigmoid(v)


def bottleneck_kernel(x_ref, w1_ref, b1_ref, w2_ref, b2_ref, m_ref, o_ref):
    x = x_ref[...]                                          # (C1, NP)

    # ---- cv1: 1x1 conv (BN folded) + SiLU --------------------------------
    t = jnp.dot(w1_ref[...], x, preferred_element_type=jnp.float32)  # (C_, NP)
    t = _silu(t + b1_ref[...])

    # ---- cv2: 3x3 conv, pad=1 (BN folded) + SiLU -------------------------
    # Single im2col matmul: build (9*C_, NP) tap matrix with lane rolls of the
    # register-resident t, zeroing out-of-image taps via precomputed masks.
    masks = m_ref[...]                                      # (9, NP)
    cols = []
    for k in range(9):
        dy, dx = k // 3 - 1, k % 3 - 1
        s = dy * W + dx                                     # flat spatial shift
        if s == 0:
            cols.append(t)                                  # center tap, no mask needed
        else:
            shifted = pltpu.roll(t, shift=(-s) % NP, axis=1)
            cols.append(shifted * masks[k:k + 1, :])
    patches = jnp.concatenate(cols, axis=0)                 # (9*C_, NP)

    y = jnp.dot(w2_ref[...], patches, preferred_element_type=jnp.float32)  # (C2, NP)
    y = _silu(y + b2_ref[...])

    if ADD:
        y = y + x
    o_ref[...] = y


def _tap_masks():
    """(9, NP) float masks: 1 where the (dy,dx)-shifted tap stays inside the image."""
    p = jnp.arange(NP, dtype=jnp.int32)
    xp = p % W
    yp = (p // W) % H
    rows = []
    for k in range(9):
        dy, dx = k // 3 - 1, k % 3 - 1
        ok = ((xp + dx >= 0) & (xp + dx < W) &
              (yp + dy >= 0) & (yp + dy < H))
        rows.append(ok.astype(jnp.float32))
    return jnp.stack(rows, axis=0)


@jax.jit
def bottleneck(x, w1, b1, w2, b2):
    """x: (N,H,W,C1) NHWC.  w1: (C1,C_) 1x1 (BN folded).  w2: (3,3,C_,C2) HWIO (BN folded)."""
    # Wrapper-side layout plumbing (XLA): channels-major, spatial-in-lanes.
    xT = jnp.transpose(x, (3, 0, 1, 2)).reshape(C1, NP)     # (C1, NP)
    w1T = jnp.transpose(w1)                                  # (C_, C1)
    b1c = b1.reshape(C_, 1)
    w2f = jnp.transpose(w2, (3, 0, 1, 2)).reshape(C2, 9 * C_)  # (C2, 9*C_) tap-major
    b2c = b2.reshape(C2, 1)
    mask = _tap_masks()                                      # (9, NP)

    grid_spec = pltpu.PrefetchScalarGridSpec(
        num_scalar_prefetch=0,
        grid=(1,),                                           # batch fully fused: one step
        in_specs=[
            pl.BlockSpec((C1, NP), lambda i: (0, 0)),
            pl.BlockSpec((C_, C1), lambda i: (0, 0)),
            pl.BlockSpec((C_, 1), lambda i: (0, 0)),
            pl.BlockSpec((C2, 9 * C_), lambda i: (0, 0)),
            pl.BlockSpec((C2, 1), lambda i: (0, 0)),
            pl.BlockSpec((9, NP), lambda i: (0, 0)),
        ],
        out_specs=pl.BlockSpec((C2, NP), lambda i: (0, 0)),
    )
    outT = pl.pallas_call(
        bottleneck_kernel,
        out_shape=jax.ShapeDtypeStruct((C2, NP), jnp.float32),
        grid_spec=grid_spec,
        compiler_params=pltpu.CompilerParams(
            dimension_semantics=("arbitrary",)),
    )(xT, w1T, b1c, w2f, b2c, mask)
    return jnp.transpose(outT.reshape(C2, N, H, W), (1, 2, 3, 0))   # back to NHWC


# ---------------- deterministic parameter construction (glue) ---------------
def make_params():
    k = jax.random.PRNGKey(0)
    k0, k1, k2 = jax.random.split(k, 3)
    x = jax.random.normal(k0, (N, H, W, C1), jnp.float32)

    eps = 1e-5
    # cv1: torch weight (C_, C1, 1, 1), BN(C_)
    w_cv1 = jax.random.normal(k1, (C_, C1), jnp.float32) * 0.1
    g1 = 1.0 + 0.05 * jnp.arange(C_, dtype=jnp.float32)
    be1 = 0.02 * jnp.arange(C_, dtype=jnp.float32)
    m1 = 0.01 * jnp.arange(C_, dtype=jnp.float32)
    v1 = 1.0 + 0.03 * jnp.arange(C_, dtype=jnp.float32)
    s1 = g1 / jnp.sqrt(v1 + eps)
    w1 = (w_cv1 * s1[:, None]).T                  # (C1, C_)
    b1 = be1 - m1 * s1                            # (C_,)

    # cv2: torch weight (C2, C_, 3, 3), BN(C2)
    w_cv2 = jax.random.normal(k2, (C2, C_, 3, 3), jnp.float32) * 0.1
    g2 = 1.0 + 0.04 * jnp.arange(C2, dtype=jnp.float32)
    be2 = -0.01 * jnp.arange(C2, dtype=jnp.float32)
    m2 = 0.02 * jnp.arange(C2, dtype=jnp.float32)
    v2 = 1.0 + 0.05 * jnp.arange(C2, dtype=jnp.float32)
    s2 = g2 / jnp.sqrt(v2 + eps)
    w2 = jnp.transpose(w_cv2, (2, 3, 1, 0)) * s2  # (3, 3, C_, C2) HWIO, BN folded
    b2 = be2 - m2 * s2                            # (C2,)
    return x, (w1, b1, w2, b2)


# ---------------- pure-JAX reference (for verification) ---------------------
def _conv_nhwc(v, w_hwio, pad):
    return lax.conv_general_dilated(
        v, w_hwio, window_strides=(1, 1), padding=[(pad, pad), (pad, pad)],
        dimension_numbers=('NHWC', 'HWIO', 'NHWC'),
        precision=lax.Precision.HIGHEST)


def ref_forward(x, params):
    w1, b1, w2, b2 = params
    t = _silu(_conv_nhwc(x, w1.reshape(1, 1, C1, C_), 0) + b1.reshape(1, 1, 1, C_))
    y = _silu(_conv_nhwc(t, w2, 1) + b2.reshape(1, 1, 1, C2))
    return x + y if ADD else y


if __name__ == "__main__":
    x, params = make_params()
    out = bottleneck(x, *params)
    jax.block_until_ready(out)
    ref = ref_forward(x, params)
    assert out.shape == (N, H, W, C2)
    err = float(jnp.max(jnp.abs(out - ref)))
    assert err < 1e-3, f"max abs err {err}"
    print("KERNEL_OK")
</pallas_src>

<mosaic_0001>
module attributes {stable_mosaic.version = 11 : i64} {
  func.func @bottleneck_kernel(%arg0: i32, %arg1: memref<32x512xf32, #tpu.memory_space<vmem>>, %arg2: memref<16x32xf32, #tpu.memory_space<vmem>>, %arg3: memref<16x1xf32, #tpu.memory_space<vmem>>, %arg4: memref<32x144xf32, #tpu.memory_space<vmem>>, %arg5: memref<32x1xf32, #tpu.memory_space<vmem>>, %arg6: memref<9x512xf32, #tpu.memory_space<vmem>>, %arg7: memref<32x512xf32, #tpu.memory_space<vmem>>) attributes {dimension_semantics = [#tpu.dimension_semantics<arbitrary>], iteration_bounds = array<i64: 1>, scalar_prefetch = 0 : i64, scratch_operands = 0 : i64, tpu.core_type = #tpu.core_type<tc>, window_params = [{pipeline_mode = #tpu.pipeline_mode<synchronous>, transform_indices = @transform_0, window_bounds = array<i64: 32, 512>}, {pipeline_mode = #tpu.pipeline_mode<synchronous>, transform_indices = @transform_1, window_bounds = array<i64: 16, 32>}, {pipeline_mode = #tpu.pipeline_mode<synchronous>, transform_indices = @transform_2, window_bounds = array<i64: 16, 1>}, {pipeline_mode = #tpu.pipeline_mode<synchronous>, transform_indices = @transform_3, window_bounds = array<i64: 32, 144>}, {pipeline_mode = #tpu.pipeline_mode<synchronous>, transform_indices = @transform_4, window_bounds = array<i64: 32, 1>}, {pipeline_mode = #tpu.pipeline_mode<synchronous>, transform_indices = @transform_5, window_bounds = array<i64: 9, 512>}, {pipeline_mode = #tpu.pipeline_mode<synchronous>, transform_indices = @transform_6, window_bounds = array<i64: 32, 512>}]} {
    %c0 = arith.constant 0 : index
    %c0_0 = arith.constant 0 : index
    %0 = vector.load %arg1[%c0, %c0_0] : memref<32x512xf32, #tpu.memory_space<vmem>>, vector<32x512xf32>
    %c0_1 = arith.constant 0 : index
    %c0_2 = arith.constant 0 : index
    %1 = vector.load %arg2[%c0_1, %c0_2] : memref<16x32xf32, #tpu.memory_space<vmem>>, vector<16x32xf32>
    %cst = arith.constant dense<0.000000e+00> : vector<16x512xf32>
    %2 = tpu.matmul %1, %0, %cst {dimension_numbers = #tpu.dot_dimension_numbers<[1], [0], [0], [1], [0, 0, 1, 1], [], []>} : vector<16x32xf32>, vector<32x512xf32>, vector<16x512xf32> -> vector<16x512xf32>
    %c0_3 = arith.constant 0 : index
    %c0_4 = arith.constant 0 : index
    %3 = vector.load %arg3[%c0_3, %c0_4] : memref<16x1xf32, #tpu.memory_space<vmem>>, vector<16x1xf32>
    %4 = vector.broadcast %3 : vector<16x1xf32> to vector<16x512xf32>
    %5 = arith.addf %2, %4 : vector<16x512xf32>
    %6 = arith.negf %5 : vector<16x512xf32>
    %7 = math.exp %6 : vector<16x512xf32>
    %cst_5 = arith.constant 1.000000e+00 : f32
    %8 = vector.broadcast %cst_5 : f32 to vector<16x512xf32>
    %9 = arith.addf %8, %7 : vector<16x512xf32>
    %10 = arith.divf %8, %9 : vector<16x512xf32>
    %11 = arith.mulf %5, %10 : vector<16x512xf32>
    %c0_6 = arith.constant 0 : index
    %c0_7 = arith.constant 0 : index
    %12 = vector.load %arg6[%c0_6, %c0_7] : memref<9x512xf32, #tpu.memory_space<vmem>>, vector<9x512xf32>
    %c17_i32 = arith.constant 17 : i32
    %13 = tpu.dynamic_rotate %11 by %c17_i32 dim 1 : vector<16x512xf32>, i32 -> vector<16x512xf32>
    %14 = vector.extract_strided_slice %12 {offsets = [0, 0], sizes = [1, 512], strides = [1, 1]} : vector<9x512xf32> to vector<1x512xf32>
    %15 = vector.broadcast %14 : vector<1x512xf32> to vector<16x512xf32>
    %16 = arith.mulf %13, %15 : vector<16x512xf32>
    %c16_i32 = arith.constant 16 : i32
    %17 = tpu.dynamic_rotate %11 by %c16_i32 dim 1 : vector<16x512xf32>, i32 -> vector<16x512xf32>
    %18 = vector.extract_strided_slice %12 {offsets = [1, 0], sizes = [1, 512], strides = [1, 1]} : vector<9x512xf32> to vector<1x512xf32>
    %19 = vector.broadcast %18 : vector<1x512xf32> to vector<16x512xf32>
    %20 = arith.mulf %17, %19 : vector<16x512xf32>
    %c15_i32 = arith.constant 15 : i32
    %21 = tpu.dynamic_rotate %11 by %c15_i32 dim 1 : vector<16x512xf32>, i32 -> vector<16x512xf32>
    %22 = vector.extract_strided_slice %12 {offsets = [2, 0], sizes = [1, 512], strides = [1, 1]} : vector<9x512xf32> to vector<1x512xf32>
    %23 = vector.broadcast %22 : vector<1x512xf32> to vector<16x512xf32>
    %24 = arith.mulf %21, %23 : vector<16x512xf32>
    %c1_i32 = arith.constant 1 : i32
    %25 = tpu.dynamic_rotate %11 by %c1_i32 dim 1 : vector<16x512xf32>, i32 -> vector<16x512xf32>
    %26 = vector.extract_strided_slice %12 {offsets = [3, 0], sizes = [1, 512], strides = [1, 1]} : vector<9x512xf32> to vector<1x512xf32>
    %27 = vector.broadcast %26 : vector<1x512xf32> to vector<16x512xf32>
    %28 = arith.mulf %25, %27 : vector<16x512xf32>
    %c511_i32 = arith.constant 511 : i32
    %29 = tpu.dynamic_rotate %11 by %c511_i32 dim 1 : vector<16x512xf32>, i32 -> vector<16x512xf32>
    %30 = vector.extract_strided_slice %12 {offsets = [5, 0], sizes = [1, 512], strides = [1, 1]} : vector<9x512xf32> to vector<1x512xf32>
    %31 = vector.broadcast %30 : vector<1x512xf32> to vector<16x512xf32>
    %32 = arith.mulf %29, %31 : vector<16x512xf32>
    %c497_i32 = arith.constant 497 : i32
    %33 = tpu.dynamic_rotate %11 by %c497_i32 dim 1 : vector<16x512xf32>, i32 -> vector<16x512xf32>
    %34 = vector.extract_strided_slice %12 {offsets = [6, 0], sizes = [1, 512], strides = [1, 1]} : vector<9x512xf32> to vector<1x512xf32>
    %35 = vector.broadcast %34 : vector<1x512xf32> to vector<16x512xf32>
    %36 = arith.mulf %33, %35 : vector<16x512xf32>
    %c496_i32 = arith.constant 496 : i32
    %37 = tpu.dynamic_rotate %11 by %c496_i32 dim 1 : vector<16x512xf32>, i32 -> vector<16x512xf32>
    %38 = vector.extract_strided_slice %12 {offsets = [7, 0], sizes = [1, 512], strides = [1, 1]} : vector<9x512xf32> to vector<1x512xf32>
    %39 = vector.broadcast %38 : vector<1x512xf32> to vector<16x512xf32>
    %40 = arith.mulf %37, %39 : vector<16x512xf32>
    %c495_i32 = arith.constant 495 : i32
    %41 = tpu.dynamic_rotate %11 by %c495_i32 dim 1 : vector<16x512xf32>, i32 -> vector<16x512xf32>
    %42 = vector.extract_strided_slice %12 {offsets = [8, 0], sizes = [1, 512], strides = [1, 1]} : vector<9x512xf32> to vector<1x512xf32>
    %43 = vector.broadcast %42 : vector<1x512xf32> to vector<16x512xf32>
    %44 = arith.mulf %41, %43 : vector<16x512xf32>
    %45 = tpu.concatenate %16, %20, %24, %28, %11, %32, %36, %40, %44 in 0 : vector<16x512xf32>, vector<16x512xf32>, vector<16x512xf32>, vector<16x512xf32>, vector<16x512xf32>, vector<16x512xf32>, vector<16x512xf32>, vector<16x512xf32>, vector<16x512xf32> -> vector<144x512xf32>
    %c0_8 = arith.constant 0 : index
    %c0_9 = arith.constant 0 : index
    %46 = vector.load %arg4[%c0_8, %c0_9] : memref<32x144xf32, #tpu.memory_space<vmem>>, vector<32x144xf32>
    %cst_10 = arith.constant dense<0.000000e+00> : vector<32x512xf32>
    %47 = tpu.matmul %46, %45, %cst_10 {dimension_numbers = #tpu.dot_dimension_numbers<[1], [0], [0], [1], [0, 0, 1, 1], [], []>} : vector<32x144xf32>, vector<144x512xf32>, vector<32x512xf32> -> vector<32x512xf32>
    %c0_11 = arith.constant 0 : index
    %c0_12 = arith.constant 0 : index
    %48 = vector.load %arg5[%c0_11, %c0_12] : memref<32x1xf32, #tpu.memory_space<vmem>>, vector<32x1xf32>
    %49 = vector.broadcast %48 : vector<32x1xf32> to vector<32x512xf32>
    %50 = arith.addf %47, %49 : vector<32x512xf32>
    %51 = arith.negf %50 : vector<32x512xf32>
    %52 = math.exp %51 : vector<32x512xf32>
    %cst_13 = arith.constant 1.000000e+00 : f32
    %53 = vector.broadcast %cst_13 : f32 to vector<32x512xf32>
    %54 = arith.addf %53, %52 : vector<32x512xf32>
    %55 = arith.divf %53, %54 : vector<32x512xf32>
    %56 = arith.mulf %50, %55 : vector<32x512xf32>
    %57 = arith.addf %56, %0 : vector<32x512xf32>
    %c0_14 = arith.constant 0 : index
    %c0_15 = arith.constant 0 : index
    %58 = vector.load %arg7[%c0_14, %c0_15] : memref<32x512xf32, #tpu.memory_space<vmem>>, vector<32x512xf32>
    tpu.vector_store %arg7[%c0_14, %c0_15], %57 {strides = array<i32>} : memref<32x512xf32, #tpu.memory_space<vmem>>, vector<32x512xf32>,
    return
  }
  func.func @transform_0(%arg0: i32) -> (i32, i32) {
    %c0_i32 = arith.constant 0 : i32
    %c0_i32_0 = arith.constant 0 : i32
    %c0_i32_1 = arith.constant 0 : i32
    return %c0_i32, %c0_i32_0 : i32, i32
  }
  func.func @transform_1(%arg0: i32) -> (i32, i32) {
    %c0_i32 = arith.constant 0 : i32
    %c0_i32_0 = arith.constant 0 : i32
    %c0_i32_1 = arith.constant 0 : i32
    return %c0_i32, %c0_i32_0 : i32, i32
  }
  func.func @transform_2(%arg0: i32) -> (i32, i32) {
    %c0_i32 = arith.constant 0 : i32
    %c0_i32_0 = arith.constant 0 : i32
    %c0_i32_1 = arith.constant 0 : i32
    return %c0_i32, %c0_i32_0 : i32, i32
  }
  func.func @transform_3(%arg0: i32) -> (i32, i32) {
    %c0_i32 = arith.constant 0 : i32
    %c0_i32_0 = arith.constant 0 : i32
    %c0_i32_1 = arith.constant 0 : i32
    return %c0_i32, %c0_i32_0 : i32, i32
  }
  func.func @transform_4(%arg0: i32) -> (i32, i32) {
    %c0_i32 = arith.constant 0 : i32
    %c0_i32_0 = arith.constant 0 : i32
    %c0_i32_1 = arith.constant 0 : i32
    return %c0_i32, %c0_i32_0 : i32, i32
  }
  func.func @transform_5(%arg0: i32) -> (i32, i32) {
    %c0_i32 = arith.constant 0 : i32
    %c0_i32_0 = arith.constant 0 : i32
    %c0_i32_1 = arith.constant 0 : i32
    return %c0_i32, %c0_i32_0 : i32, i32
  }
  func.func @transform_6(%arg0: i32) -> (i32, i32) {
    %c0_i32 = arith.constant 0 : i32
    %c0_i32_0 = arith.constant 0 : i32
    %c0_i32_1 = arith.constant 0 : i32
    return %c0_i32, %c0_i32_0 : i32, i32
  }
}

</mosaic_0001>

<bundles_post_ra>
// kernel: bottleneck.1
= control target key start
LH: loop header
LB: loop body
LE: loop exit
PB: predicated region body
PF: predicated region fallthrough
CT: control target
= control target key end

     0   :  { %v1445_v3 = vmov 0   ;;  %vm53_vm0 = vcmask 261120   ;;  %s1448_s13 = smov 112   ;;  %s1449_s14 = smov 1   ;;  %s2686_s0 = inlined_call_operand.vmem [shape: f32[32,512], index: 0, kind: input, shape index: {}]   ;;  %s2687_s2 = inlined_call_operand.vmem [shape: f32[16,1], index: 2, kind: input, shape index: {}]   ;;  %s2688_s1 = inlined_call_operand.vmem [shape: f32[16,32], index: 1, kind: input, shape index: {}]   ;;  %s2689_s5 = inlined_call_operand.vmem [shape: f32[9,512], index: 5, kind: input, shape index: {}]   ;;  %s2690_s4 = inlined_call_operand.vmem [shape: f32[32,1], index: 4, kind: input, shape index: {}]   ;;  %s2691_s3 = inlined_call_operand.vmem [shape: f32[32,144], index: 3, kind: input, shape index: {}]   ;;  %s2692_s6 = inlined_call_operand.vmem [shape: f32[32,512], index: 6, kind: output, shape index: {}]  }
   0x1   :  { %v35_v0 = vld [vmem:[%s2686_s0 + $0x60] sm:$0xff]  ;;  %v36_v1 = vld [vmem:[%s2686_s0 + $0x68] sm:$0xff]  ;;  %v37_v2 = vld [vmem:[%s2686_s0 + $0x70] sm:$0xff]  ;;  %1326 = vset.pattern.permute.xlu0 %v1445_v3  ;;  %1327 = vset.pattern.permute.xlu1 %v1445_v3  ;;  %s1450_s15 = smov 127   ;;  %s1451_s16 = smov 15  }
   0x2   :  { %72 = vmatpush.msra.mxu0 %v35_v0  ;;  %95 = vmatpush.msra.mxu1 %v36_v1  ;;  %v38_v4 = vld [vmem:[%s2686_s0 + $0x78] sm:$0xff]  ;;  %v42_v5 = vld [vmem:[%s2687_s2 + $0x8] sm:$0xff]  ;;  %v31_v6 = vld [vmem:[%s2686_s0 + $0x40] sm:$0xff]  ;;  %s1452_s17 = smov 16   ;;  %s1453_s18 = smov 17  }
   0x3   :  { %118 = vmatpush.msra.mxu2 %v37_v2  ;;  %141 = vmatpush.msra.mxu3 %v38_v4  ;;  %v32_v7 = vld [vmem:[%s2686_s0 + $0x48] sm:$0xff]  ;;  %v33_v8 = vld [vmem:[%s2686_s0 + $0x50] sm:$0xff]  ;;  %v34_v9 = vld [vmem:[%s2686_s0 + $0x58] sm:$0xff] }
   0x4   :  { %50 = vperm.xlu0 %1326, %v42_v5   ;;  %73 = vmatpush.msra.mxu0 %v31_v6  ;;  %v27_v10 = vld [vmem:[%s2686_s0 + $0x20] sm:$0xff]  ;;  %v28_v11 = vld [vmem:[%s2686_s0 + $0x28] sm:$0xff]  ;;  %v29_v12 = vld [vmem:[%s2686_s0 + $0x30] sm:$0xff] }
   0x5   :  { %96 = vmatpush.msra.mxu1 %v32_v7  ;;  %119 = vmatpush.msra.mxu2 %v33_v8  ;;  %v30_v13 = vld [vmem:[%s2686_s0 + $0x38] sm:$0xff]  ;;  %v23_v14 = vld [vmem:[%s2686_s0] sm:$0xff]  ;;  %v24_v15 = vld [vmem:[%s2686_s0 + $0x8] sm:$0xff] }
   0x6   :  { %142 = vmatpush.msra.mxu3 %v34_v9  ;;  %74 = vmatpush.msra.mxu0 %v27_v10  ;;  %v25_v16 = vld [vmem:[%s2686_s0 + $0x10] sm:$0xff]  ;;  %v26_v17 = vld [vmem:[%s2686_s0 + $0x18] sm:$0xff]  ;;  %v39_v18 = vld [vmem:[%s2688_s1] sm:$0xff] }
   0x7   :  { %97 = vmatpush.msra.mxu1 %v28_v11  ;;  %120 = vmatpush.msra.mxu2 %v29_v12  ;;  %v41_v19 = vld [vmem:[%s2687_s2] sm:$0xff]  ;;  %v40_v20 = vld [vmem:[%s2688_s1 + $0x8] sm:$0xff]  ;;  %s1446_s1 = smov 111   ;;  %s1447_s2 = smov 113  }
   0x8   :  { %143 = vmatpush.msra.mxu3 %v30_v13  ;;  %75 = vmatpush.msra.mxu0 %v23_v14 }
   0x9   :  { %98 = vmatpush.msra.mxu1 %v24_v15  ;;  %121 = vmatpush.msra.mxu2 %v25_v16 }
   0xa   :  { %144 = vmatpush.msra.mxu3 %v26_v17  ;;  %1251 = vmatmul.msk.f32.vlgmr.msra.gmra.mxu0 %vm53_vm0, %v39_v18 }
   0xb   :  { %1253 = vmatmul.msk.f32.vlgmr.msra.gmra.mxu1 %vm53_vm0, %v39_v18  ;;  %1255 = vmatmul.msk.f32.vlgmr.msra.gmra.mxu2 %vm53_vm0, %v39_v18 }
   0xc   :  { %1257 = vmatmul.msk.f32.vlgmr.msra.gmra.mxu3 %vm53_vm0, %v39_v18  ;;  %45 = vperm.xlu0 %1326, %v41_v19  }
   0xd   :  { %1328 = vset.pattern.permute.xlu2 %v1445_v3 }
  0x12   :  { %1252 = vmatmul.msk.f32.gmra.mxu0 %vm53_vm0, %v40_v20 }
  0x13   :  { %1254 = vmatmul.msk.f32.gmra.mxu1 %vm53_vm0, %v40_v20  ;;  %1256 = vmatmul.msk.f32.gmra.mxu2 %vm53_vm0, %v40_v20 }
  0x14   :  { %1258 = vmatmul.msk.f32.gmra.mxu3 %vm53_vm0, %v40_v20 }
  0x76   :  { %v1557_v21 = vpop.permute.xlu0 %50 }
  0x7e   :  { %v46_v22 = vpop.permute.xlu0 %45 }
  0x87   :  { %v77_v23 = vpop.f32.mrf.mxu0 }
  0x88   :  { %v78_v24 = vadd.f32 %v77_v23, %v46_v22  ;;  %v100_v25 = vpop.f32.mrf.mxu1 }
  0x89   :  { %v101_v26 = vadd.f32 %v100_v25, %v46_v22 }
  0x8a   :  { %v1259_v27 = vmul.f32 -1.442695, %v78_v24 }
  0x8b   :  { %v1260_v28 = vmul.f32 -1.442695, %v101_v26 }
  0x8c   :  { %1333 = vpow2.f32 %v1259_v27 }
  0x8d   :  { %1335 = vpow2.f32 %v1260_v28 }
  0x8e   :  { %v123_v29 = vpop.f32.mrf.mxu2 }
  0x8f   :  { %v1559_v33 = vadd.f32 %v123_v29, %v46_v22  ;;  %v146_v43 = vpop.f32.mrf.mxu3  ;;  %v80_v14 = vpop.f32.mrf.mxu0 }
  0x90   :  { %v1562_v49 = vadd.f32 %v146_v43, %v46_v22  ;;  %v103_v4 = vpop.f32.mrf.mxu1  ;;  %v1598_v17 = vadd.f32 %v80_v14, %v1557_v21 }
  0x91   :  { %v1261_v35 = vmul.f32 -1.442695, %v1559_v33  ;;  %v1588_v6 = vadd.f32 %v103_v4, %v1557_v21 }
  0x92   :  { %v1334_v30 = vpop.eup %1333  ;;  %v1262_v57 = vmul.f32 -1.442695, %v1562_v49  ;;  %v1263_v20 = vmul.f32 -1.442695, %v1598_v17 }
  0x93   :  { %v1336_v31 = vpop.eup %1335  ;;  %v176_v32 = vadd.f32 1.0, %v1334_v30  ;;  %v1264_v11 = vmul.f32 -1.442695, %v1588_v6 }
  0x94   :  { %v177_v34 = vadd.f32 1.0, %v1336_v31 }
  0x95   :  { %1337 = vrcp.f32 %v176_v32  ;;  %v195_v55 = vand.u32 2147483648, %v176_v32  ;;  %vm189_vm6 = vweird.f32 %v176_v32  ;;  %v193_v58 = vand.u32 2147483647, %v176_v32 }
  0x96   :  { %1339 = vrcp.f32 %v177_v34  ;;  %v210_v42 = vand.u32 2147483648, %v177_v34  ;;  %v208_v46 = vand.u32 2147483647, %v177_v34  ;;  %vm204_vm2 = vweird.f32 %v177_v34 }
  0x97   :  { %1341 = vpow2.f32 %v1261_v35  ;;  %v196_v60 = vor.u32 1.1754944e-38, %v195_v55  ;;  %vm194_vm8 = vcmp.eq.f32.partialorder %v193_v58, 8.507059e+37 }
  0x98   :  { %v211_v50 = vor.u32 1.1754944e-38, %v210_v42  ;;  %vm209_vm4 = vcmp.eq.f32.partialorder %v208_v46, 8.507059e+37 }
  0x9b   :  { %v1338_v36 = vpop.eup %1337 }
  0x9c   :  { %v1340_v37 = vpop.eup %1339  ;;  %v185_v38 = vmul.f32 %v1338_v36, %v176_v32  ;;  %vm190_vm5 = vweird.f32 %v1338_v36 }
  0x9d   :  { %v200_v39 = vmul.f32 %v1340_v37, %v177_v34  ;;  %v1342_v44 = vpop.eup %1341  ;;  %vm205_vm1 = vweird.f32 %v1340_v37  ;;  %vm191_vm7 = vmor %vm189_vm6, %vm190_vm5 }
  0x9e   :  { %v186_v40 = vsub.f32 1.0, %v185_v38  ;;  %vm206_vm3 = vmor %vm204_vm2, %vm205_vm1  ;;  %v178_v51 = vadd.f32 1.0, %v1342_v44  ;;  %v126_v38 = vpop.f32.mrf.mxu2 }
  0x9f   :  { %v201_v41 = vsub.f32 1.0, %v200_v39 }
  0xa0   :  { %v187_v47 = vmul.f32 %v1338_v36, %v186_v40  ;;  %1343 = vrcp.f32 %v178_v51  ;;  %v225_v9 = vand.u32 2147483648, %v178_v51  ;;  %vm219_vm10 = vweird.f32 %v178_v51 }
  0xa1   :  { %v202_v45 = vmul.f32 %v1340_v37, %v201_v41  ;;  %1345 = vpow2.f32 %v1262_v57  ;;  %v223_v10 = vand.u32 2147483647, %v178_v51  ;;  %v1632_v41 = vadd.f32 %v126_v38, %v1557_v21 }
  0xa2   :  { %v188_v53 = vadd.f32 %v1338_v36, %v187_v47  ;;  %v226_v15 = vor.u32 1.1754944e-38, %v225_v9  ;;  %v149_v47 = vpop.f32.mrf.mxu3 }
  0xa3   :  { %v203_v48 = vadd.f32 %v1340_v37, %v202_v45  ;;  %vm224_vm12 = vcmp.eq.f32.partialorder %v223_v10, 8.507059e+37  ;;  %v1265_v46 = vmul.f32 -1.442695, %v1632_v41 }
  0xa4   :  { %v192_v59 = vsel %vm191_vm7, %v1338_v36, %v188_v53 }
  0xa5   :  { %v207_v52 = vsel %vm206_vm3, %v1340_v37, %v203_v48  ;;  %v197_v61 = vsel %vm194_vm8, %v196_v60, %v192_v59 }
  0xa6   :  { %v212_v54 = vsel %vm209_vm4, %v211_v50, %v207_v52  ;;  %v1344_v62 = vpop.eup %1343  ;;  %v1573_v63 = vmul.f32 %v197_v61, %v78_v24 }
  0xa7   :  { %v1564_v56 = vmul.f32 %v212_v54, %v101_v26  ;;  %v1346_v0 = vpop.eup %1345  ;;  %v215_v1 = vmul.f32 %v1344_v62, %v178_v51  ;;  %vm220_vm9 = vweird.f32 %v1344_v62  ;;  %v1642_v51 = vadd.f32 %v149_v47, %v1557_v21 }
  0xa8   :  { %v179_v2 = vadd.f32 1.0, %v1346_v0  ;;  %vm221_vm11 = vmor %vm219_vm10, %vm220_vm9 }
  0xa9   :  { %585 = vrot.lane.b32.xlu1 %v1564_v56, %s1446_s1  ;;  %511 = vrot.lane.b32.xlu0 %v1564_v56, %s1447_s2  ;;  %v216_v3 = vsub.f32 1.0, %v215_v1  ;;  %v1266_v57 = vmul.f32 -1.442695, %v1642_v51 }
  0xaa   :  { %548 = vrot.lane.b32.xlu2 %v1564_v56, %s1448_s13  ;;  %1347 = vrcp.f32 %v179_v2  ;;  %v240_v26 = vand.u32 2147483648, %v179_v2  ;;  %vm234_vm14 = vweird.f32 %v179_v2  ;;  %v238_v27 = vand.u32 2147483647, %v179_v2 }
  0xab   :  { %v217_v5 = vmul.f32 %v1344_v62, %v216_v3  ;;  %1349 = vpow2.f32 %v1264_v11 }
  0xac   :  { %1351 = vpow2.f32 %v1263_v20  ;;  %v241_v30 = vor.u32 1.1754944e-38, %v240_v26  ;;  %vm239_vm0 = vcmp.eq.f32.partialorder %v238_v27, 8.507059e+37 }
  0xad   :  { %v218_v7 = vadd.f32 %v1344_v62, %v217_v5  ;;  %v336_v5 = vlaneseq }
  0xaf   :  { %v222_v12 = vsel %vm221_vm11, %v1344_v62, %v218_v7  ;;  %v1671_v9 = vand.u32 127, %v336_v5 }
  0xb0   :  { %v1348_v8 = vpop.eup %1347  ;;  %v227_v16 = vsel %vm224_vm12, %v226_v15, %v222_v12 }
  0xb1   :  { %437 = vrot.lane.b32.xlu1 %v1564_v56, %s1449_s14  ;;  %474 = vrot.lane.b32.xlu0 %v1564_v56, %s1450_s15  ;;  %v230_v13 = vmul.f32 %v1348_v8, %v179_v2  ;;  %v1601_v19 = vmul.f32 %v227_v16, %v1559_v33  ;;  %v1350_v22 = vpop.eup %1349  ;;  %vm235_vm13 = vweird.f32 %v1348_v8  ;;  %vm560_vm9 = vcmp.lt.s32.totalorder %v1671_v9, 112 }
  0xb2   :  { %544 = vrot.lane.b32.xlu2 %v1573_v63, %s1448_s13  ;;  %v181_v24 = vadd.f32 1.0, %v1350_v22  ;;  %vm236_vm15 = vmor %vm234_vm14, %vm235_vm13  ;;  %v1352_v29 = vpop.eup %1351 }
  0xb3   :  { %v231_v18 = vsub.f32 1.0, %v230_v13  ;;  %v180_v32 = vadd.f32 1.0, %v1352_v29 }
  0xb4   :  { %1353 = vrcp.f32 %v181_v24  ;;  %v270_v44 = vand.u32 2147483648, %v181_v24  ;;  %vm264_vm2 = vweird.f32 %v181_v24  ;;  %v268_v45 = vand.u32 2147483647, %v181_v24 }
  0xb5   :  { %v232_v23 = vmul.f32 %v1348_v8, %v231_v18  ;;  %1355 = vrcp.f32 %v180_v32  ;;  %v255_v54 = vand.u32 2147483648, %v180_v32  ;;  %vm249_vm6 = vweird.f32 %v180_v32 }
  0xb6   :  { %v271_v50 = vor.u32 1.1754944e-38, %v270_v44  ;;  %vm269_vm4 = vcmp.eq.f32.partialorder %v268_v45, 8.507059e+37  ;;  %1357 = vpow2.f32 %v1265_v46  ;;  %v253_v58 = vand.u32 2147483647, %v180_v32 }
  0xb7   :  { %v233_v25 = vadd.f32 %v1348_v8, %v232_v23  ;;  %v256_v60 = vor.u32 1.1754944e-38, %v255_v54  ;;  %1359 = vpow2.f32 %v1266_v57 }
  0xb8   :  { %vm254_vm8 = vcmp.eq.f32.partialorder %v253_v58, 8.507059e+37 }
  0xb9   :  { %396 = vrot.lane.b32.xlu1 %v1573_v63, %s1451_s16  ;;  %470 = vrot.lane.b32.xlu0 %v1573_v63, %s1450_s15  ;;  %v237_v28 = vsel %vm236_vm15, %v1348_v8, %v233_v25 }
  0xba   :  { %507 = vrot.lane.b32.xlu2 %v1573_v63, %s1447_s2  ;;  %v242_v31 = vsel %vm239_vm0, %v241_v30, %v237_v28  ;;  %v1354_v33 = vpop.eup %1353 }
  0xbb   :  { %v1617_v34 = vmul.f32 %v242_v31, %v1562_v49  ;;  %v260_v35 = vmul.f32 %v1354_v33, %v181_v24  ;;  %v1356_v37 = vpop.eup %1355  ;;  %vm265_vm1 = vweird.f32 %v1354_v33 }
  0xbc   :  { %v245_v40 = vmul.f32 %v1356_v37, %v180_v32  ;;  %vm266_vm3 = vmor %vm264_vm2, %vm265_vm1  ;;  %vm250_vm5 = vweird.f32 %v1356_v37  ;;  %v1358_v59 = vpop.eup %1357  ;;  %vm523_vm1 = vcmp.lt.s32.totalorder %v1671_v9, 113 }
  0xbd   :  { %v261_v36 = vsub.f32 1.0, %v260_v35  ;;  %vm251_vm7 = vmor %vm249_vm6, %vm250_vm5  ;;  %v182_v61 = vadd.f32 1.0, %v1358_v59  ;;  %v1360_v1 = vpop.eup %1359  ;;  %vm449_vm5 = vcmp.lt.s32.totalorder %v1671_v9, 1  ;;  %vm375_vm6 = vcmp.lt.s32.totalorder %v1671_v9, 16 }
  0xbe   :  { %v246_v43 = vsub.f32 1.0, %v245_v40  ;;  %v183_v2 = vadd.f32 1.0, %v1360_v1  ;;  %v626_v1 = vld [vmem:[%s2690_s4] sm:$0xff] }
  0xbf   :  { %v262_v39 = vmul.f32 %v1354_v33, %v261_v36  ;;  %1361 = vrcp.f32 %v182_v61  ;;  %v285_v16 = vand.u32 2147483648, %v182_v61  ;;  %vm279_vm11 = vweird.f32 %v182_v61 }
  0xc0   :  { %v247_v49 = vmul.f32 %v1356_v37, %v246_v43  ;;  %1363 = vrcp.f32 %v183_v2  ;;  %v300_v26 = vand.u32 2147483648, %v183_v2  ;;  %vm294_vm15 = vweird.f32 %v183_v2 }
  0xc1   :  { %363 = vrot.lane.b32.xlu1 %v1564_v56, %s1452_s17  ;;  %433 = vrot.lane.b32.xlu0 %v1573_v63, %s1449_s14  ;;  %v263_v42 = vadd.f32 %v1354_v33, %v262_v39  ;;  %v286_v22 = vor.u32 1.1754944e-38, %v285_v16  ;;  %v298_v28 = vand.u32 2147483647, %v183_v2 }
  0xc2   :  { %581 = vrot.lane.b32.xlu2 %v1573_v63, %s1446_s1  ;;  %v248_v53 = vadd.f32 %v1356_v37, %v247_v49  ;;  %v301_v30 = vor.u32 1.1754944e-38, %v300_v26  ;;  %v1883_v26 = vld [vmem:[%s2689_s5] sm:$0xff] }
  0xc3   :  { %v267_v48 = vsel %vm266_vm3, %v1354_v33, %v263_v42  ;;  %vm299_vm2 = vcmp.eq.f32.partialorder %v298_v28, 8.507059e+37  ;;  %vm412_vm3 = vcmp.lt.s32.totalorder %v1671_v9, 15 }
  0xc4   :  { %v272_v52 = vsel %vm269_vm4, %v271_v50, %v267_v48  ;;  %v252_v21 = vsel %vm251_vm7, %v1356_v37, %v248_v53  ;;  %vm486_vm4 = vcmp.lt.s32.totalorder %v1671_v9, 127  ;;  %vm338_vm7 = vcmp.lt.s32.totalorder %v1671_v9, 17 }
  0xc5   :  { %v1645_v55 = vmul.f32 %v272_v52, %v1588_v6  ;;  %v257_v62 = vsel %vm254_vm8, %v256_v60, %v252_v21  ;;  %v1362_v3 = vpop.eup %1361  ;;  %vm597_vm8 = vcmp.lt.s32.totalorder %v1671_v9, 111 }
  0xc6   :  { %v1655_v0 = vmul.f32 %v257_v62, %v1598_v17  ;;  %v275_v4 = vmul.f32 %v1362_v3, %v182_v61  ;;  %v1364_v8 = vpop.eup %1363  ;;  %vm280_vm10 = vweird.f32 %v1362_v3  ;;  %v283_v17 = vand.u32 2147483647, %v182_v61 }
  0xc7   :  { %v290_v11 = vmul.f32 %v1364_v8, %v183_v2  ;;  %vm281_vm12 = vmor %vm279_vm11, %vm280_vm10  ;;  %vm295_vm14 = vweird.f32 %v1364_v8  ;;  %vm650_vm10 = vcmask 130048  }
  0xc8   :  { %v276_v7 = vsub.f32 1.0, %v275_v4  ;;  %vm284_vm13 = vcmp.eq.f32.partialorder %v283_v17, 8.507059e+37  ;;  %vm296_vm0 = vmor %vm294_vm15, %vm295_vm14 }
  0xc9   :  { %515 = vrot.lane.b32.xlu1 %v1601_v19, %s1447_s2  ;;  %359 = vrot.lane.b32.xlu0 %v1573_v63, %s1452_s17  ;;  %v291_v14 = vsub.f32 1.0, %v290_v11 }
  0xca   :  { %400 = vrot.lane.b32.xlu2 %v1564_v56, %s1451_s16  ;;  %v277_v10 = vmul.f32 %v1362_v3, %v276_v7 }
  0xcb   :  { %v292_v20 = vmul.f32 %v1364_v8, %v291_v14 }
  0xcc   :  { %v278_v13 = vadd.f32 %v1362_v3, %v277_v10  ;;  %v629_v10 = vld [vmem:[%s2690_s4 + $0x18] sm:$0xff] }
  0xcd   :  { %v293_v25 = vadd.f32 %v1364_v8, %v292_v20 }
  0xce   :  { %v282_v18 = vsel %vm281_vm12, %v1362_v3, %v278_v13 }
  0xcf   :  { %v287_v23 = vsel %vm284_vm13, %v286_v22, %v282_v18  ;;  %v297_v29 = vsel %vm296_vm0, %v1364_v8, %v293_v25 }
  0xd0   :  { %v1697_v27 = vmul.f32 %v287_v23, %v1632_v41  ;;  %v302_v33 = vsel %vm299_vm2, %v301_v30, %v297_v29  ;;  %v569_v30 = vperm.slane %v1883_v26, 7 }
  0xd1   :  { %478 = vrot.lane.b32.xlu1 %v1601_v19, %s1450_s15  ;;  %324 = vrot.lane.b32.xlu0 %v1564_v56, %s1453_s18  ;;  %v1716_v37 = vmul.f32 %v302_v33, %v1642_v51 }
  0xd2   :  { %320 = vrot.lane.b32.xlu2 %v1573_v63, %s1453_s18 }
  0xd9   :  { %556 = vrot.lane.b32.xlu1 %v1617_v34, %s1448_s13  ;;  %445 = vrot.lane.b32.xlu0 %v1617_v34, %s1449_s14 }
  0xda   :  { %552 = vrot.lane.b32.xlu2 %v1601_v19, %s1448_s13 }
  0xe1   :  { %371 = vrot.lane.b32.xlu1 %v1617_v34, %s1452_s17  ;;  %519 = vrot.lane.b32.xlu0 %v1617_v34, %s1447_s2 }
  0xe2   :  { %589 = vrot.lane.b32.xlu2 %v1601_v19, %s1446_s1 }
  0xe9   :  { %332 = vrot.lane.b32.xlu1 %v1617_v34, %s1453_s18  ;;  %441 = vrot.lane.b32.xlu0 %v1601_v19, %s1449_s14 }
  0xea   :  { %408 = vrot.lane.b32.xlu2 %v1617_v34, %s1451_s16 }
  0xf1   :  { %550 = vrot.lane.b32.xlu1 %v1645_v55, %s1448_s13  ;;  %513 = vrot.lane.b32.xlu0 %v1645_v55, %s1447_s2 }
  0xf2   :  { %482 = vrot.lane.b32.xlu2 %v1617_v34, %s1450_s15 }
  0xf9   :  { %587 = vrot.lane.b32.xlu1 %v1645_v55, %s1446_s1  ;;  %476 = vrot.lane.b32.xlu0 %v1645_v55, %s1450_s15 }
  0xfa   :  { %546 = vrot.lane.b32.xlu2 %v1655_v0, %s1448_s13 }
 0x101   :  { %439 = vrot.lane.b32.xlu1 %v1645_v55, %s1449_s14  ;;  %472 = vrot.lane.b32.xlu0 %v1655_v0, %s1450_s15 }
 0x102   :  { %509 = vrot.lane.b32.xlu2 %v1655_v0, %s1447_s2 }
 0x104   :  { %v1669_v6 = vpop.permute.xlu2 %548 }
 0x109   :  { %402 = vrot.lane.b32.xlu1 %v1645_v55, %s1451_s16  ;;  %435 = vrot.lane.b32.xlu0 %v1655_v0, %s1449_s14 }
 0x10a   :  { %583 = vrot.lane.b32.xlu2 %v1655_v0, %s1446_s1 }
 0x10c   :  { %v1680_v12 = vpop.permute.xlu2 %544 }
 0x10d   :  { %v1686_v15 = vsel %vm560_vm9, %v1680_v12, %v1669_v6 }
 0x111   :  { %322 = vrot.lane.b32.xlu1 %v1655_v0, %s1453_s18  ;;  %398 = vrot.lane.b32.xlu0 %v1655_v0, %s1451_s16 }
 0x112   :  { %361 = vrot.lane.b32.xlu2 %v1655_v0, %s1452_s17 }
 0x114   :  { %v1694_v24 = vpop.permute.xlu2 %507 }
 0x119   :  { %554 = vrot.lane.b32.xlu1 %v1697_v27, %s1448_s13  ;;  %365 = vrot.lane.b32.xlu0 %v1645_v55, %s1452_s17 }
 0x11a   :  { %326 = vrot.lane.b32.xlu2 %v1645_v55, %s1453_s18 }
 0x11b   :  { %v1706_v31 = vpop.permute.xlu1 %585  ;;  %v512_v32 = vpop.permute.xlu0 %511 }
 0x11c   :  { %v1711_v35 = vsel %vm523_vm1, %v1694_v24, %v512_v32  ;;  %v1713_v36 = vpop.permute.xlu2 %581 }
 0x121   :  { %517 = vrot.lane.b32.xlu1 %v1697_v27, %s1447_s2  ;;  %558 = vrot.lane.b32.xlu0 %v1716_v37, %s1448_s13 }
 0x122   :  { %591 = vrot.lane.b32.xlu2 %v1697_v27, %s1446_s1 }
 0x123   :  { %v1724_v38 = vpop.permute.xlu1 %437  ;;  %v475_v39 = vpop.permute.xlu0 %474 }
 0x124   :  { %v1726_v40 = vpop.permute.xlu2 %400 }
 0x129   :  { %480 = vrot.lane.b32.xlu1 %v1697_v27, %s1450_s15  ;;  %373 = vrot.lane.b32.xlu0 %v1716_v37, %s1452_s17 }
 0x12a   :  { %447 = vrot.lane.b32.xlu2 %v1716_v37, %s1449_s14 }
 0x12b   :  { %v397_v41 = vpop.permute.xlu1 %396  ;;  %v471_v42 = vpop.permute.xlu0 %470 }
 0x12c   :  { %v1739_v43 = vsel %vm412_vm3, %v397_v41, %v1726_v40  ;;  %v1743_v44 = vsel %vm486_vm4, %v471_v42, %v475_v39  ;;  %v321_v45 = vpop.permute.xlu2 %320 }
 0x131   :  { %410 = vrot.lane.b32.xlu1 %v1716_v37, %s1451_s16  ;;  %334 = vrot.lane.b32.xlu0 %v1716_v37, %s1453_s18 }
 0x132   :  { %521 = vrot.lane.b32.xlu2 %v1716_v37, %s1447_s2 }
 0x133   :  { %v1752_v46 = vpop.permute.xlu1 %363  ;;  %v1754_v47 = vpop.permute.xlu0 %433 }
 0x134   :  { %v1760_v48 = vsel %vm449_vm5, %v1754_v47, %v1724_v38  ;;  %v553_v49 = vpop.permute.xlu2 %552 }
 0x135   :  { %v1765_v50 = vsel %vm560_vm9, %v1669_v6, %v553_v49 }
 0x139   :  { %484 = vrot.lane.b32.xlu1 %v1716_v37, %s1450_s15  ;;  %369 = vrot.lane.b32.xlu0 %v1697_v27, %s1452_s17 }
 0x13a   :  { %404 = vrot.lane.b32.xlu2 %v1601_v19, %s1451_s16 }
 0x13b   :  { %v516_v51 = vpop.permute.xlu1 %515  ;;  %v360_v52 = vpop.permute.xlu0 %359 }
 0x13c   :  { %v1776_v53 = vsel %vm523_vm1, %v512_v32, %v516_v51  ;;  %v1781_v54 = vsel %vm375_vm6, %v360_v52, %v1752_v46  ;;  %v1783_v57 = vpop.permute.xlu2 %589 }
 0x141   :  { %406 = vrot.lane.b32.xlu1 %v1697_v27, %s1451_s16  ;;  %593 = vrot.lane.b32.xlu0 %v1617_v34, %s1446_s1 }
 0x142   :  { %443 = vrot.lane.b32.xlu2 %v1697_v27, %s1449_s14 }
 0x143   :  { %v479_v58 = vpop.permute.xlu1 %478  ;;  %v1792_v59 = vpop.permute.xlu0 %324 }
 0x144   :  { %v1796_v21 = vsel %vm486_vm4, %v475_v39, %v479_v58  ;;  %v1801_v60 = vsel %vm338_vm7, %v321_v45, %v1792_v59  ;;  %v1803_v61 = vpop.permute.xlu2 %408 }
 0x145   :  { %v1808_v62 = vsel %vm412_vm3, %v1803_v61, %v397_v41  ;;  %v573_v41 = vmul.f32 %v569_v30, %v1686_v15  ;;  %v602_v15 = vsel %vm597_vm8, %v1713_v36, %v1706_v31 }
 0x149   :  { %595 = vrot.lane.b32.xlu1 %v1716_v37, %s1446_s1  ;;  %632 = vperm.xlu0 %1326, %v626_v1  }
 0x14a   :  { %367 = vrot.lane.b32.xlu2 %v1601_v19, %s1452_s17 }
 0x14b   :  { %v557_v2 = vpop.permute.xlu1 %556  ;;  %v1817_v3 = vpop.permute.xlu0 %445 }
 0x14c   :  { %v1821_v4 = vsel %vm560_vm9, %v553_v49, %v557_v2  ;;  %v1826_v5 = vsel %vm560_vm9, %v557_v2, %v1680_v12  ;;  %v483_v6 = vpop.permute.xlu2 %482 }
 0x14d   :  { %v1830_v7 = vsel %vm486_vm4, %v479_v58, %v483_v6  ;;  %v1834_v8 = vsel %vm486_vm4, %v483_v6, %v471_v42  ;;  %v532_v42 = vperm.slane %v1883_v26, 6  ;;  %v1329_v58 = vld [vmem:[%s2689_s5 + $0x20] ss:$0 sm:$0xff] }
 0x151   :  { %330 = vrot.lane.b32.xlu1 %v1697_v27, %s1453_s18  ;;  %647 = vperm.xlu0 %1326, %v629_v10   ;;  %v610_v10 = vmul.f32 %v1329_v58, %v602_v15 }
 0x152   :  { %328 = vrot.lane.b32.xlu2 %v1601_v19, %s1453_s18 }
 0x153   :  { %v1843_v11 = vpop.permute.xlu1 %371  ;;  %v520_v12 = vpop.permute.xlu0 %519 }
 0x154   :  { %2697 = vst [vmem:[#allocation2_spill] sm:$0xff] %v1843_v11  ;;  %v1848_v13 = vsel %vm375_vm6, %v1843_v11, %v360_v52  ;;  %v1852_v14 = vsel %vm523_vm1, %v516_v51, %v520_v12  ;;  %v1857_v16 = vsel %vm523_vm1, %v520_v12, %v1694_v24  ;;  %v1859_v17 = vpop.permute.xlu2 %546  ;;  %v536_v52 = vmul.f32 %v532_v42, %v1711_v35 }
 0x15b   :  { %v1861_v18 = vpop.permute.xlu1 %332  ;;  %v442_v20 = vpop.permute.xlu0 %441 }
 0x15c   :  { %2698 = vst [vmem:[#allocation3_spill] sm:$0xff] %v1861_v18  ;;  %v1866_v22 = vsel %vm338_vm7, %v1861_v18, %v321_v45  ;;  %v1871_v23 = vsel %vm449_vm5, %v442_v20, %v1817_v3  ;;  %v1876_v24 = vsel %vm449_vm5, %v1724_v38, %v442_v20  ;;  %v1878_v25 = vpop.permute.xlu2 %509  ;;  %v495_v20 = vperm.slane %v1883_v26, 5 }
 0x163   :  { %v1885_v28 = vpop.permute.xlu1 %550  ;;  %v1887_v29 = vpop.permute.xlu0 %513 }
 0x164   :  { %v566_v32 = vsel %vm560_vm9, %v1859_v17, %v1885_v28  ;;  %v1894_v33 = vpop.permute.xlu2 %583  ;;  %v529_v39 = vsel %vm523_vm1, %v1878_v25, %v1887_v29 }
 0x165   :  { %v577_v38 = vmul.f32 %v569_v30, %v566_v32  ;;  %v540_v45 = vmul.f32 %v532_v42, %v529_v39  ;;  %v499_v39 = vmul.f32 %v495_v20, %v1743_v44 }
 0x167   :  { %663 = vmatpush.msrb.mxu0 %v577_v38 }
 0x169   :  { %664 = vmatpush.msrb.mxu0 %v573_v41 }
 0x16b   :  { %v588_v49 = vpop.permute.xlu1 %587  ;;  %v1903_v51 = vpop.permute.xlu0 %476  ;;  %665 = vmatpush.msrb.mxu0 %v540_v45 }
 0x16c   :  { %v603_v1 = vsel %vm597_vm8, %v1894_v33, %v588_v49  ;;  %v1916_v2 = vpop.permute.xlu2 %361 }
 0x16d   :  { %666 = vmatpush.msrb.mxu0 %v536_v52  ;;  %v614_v6 = vmul.f32 %v1329_v58, %v603_v1  ;;  %v1330_v52 = vld [vmem:[%s2689_s5 + $0x28] ss:$0 sm:$0xff]  ;;  %v600_v58 = vsel %vm597_vm8, %v1706_v31, %v1783_v57  ;;  %v456_v31 = vsel %vm449_vm5, %v1817_v3, %v1754_v47 }
 0x16e   :  { %v1975_v3 = vld [vmem:[%s2689_s5 + $0x8] sm:$0xff] }
 0x16f   :  { %706 = vmatpush.msrb.mxu1 %v614_v6 }
 0x171   :  { %707 = vmatpush.msrb.mxu1 %v610_v10 }
 0x173   :  { %v1918_v35 = vpop.permute.xlu1 %439  ;;  %v1920_v12 = vpop.permute.xlu0 %472 }
 0x174   :  { %v492_v30 = vsel %vm486_vm4, %v1920_v12, %v1903_v51  ;;  %v1927_v32 = vpop.permute.xlu2 %326 }
 0x175   :  { %v503_v38 = vmul.f32 %v495_v20, %v492_v30  ;;  %v458_v20 = vperm.slane %v1883_v26, 3  ;;  %v1966_v30 = vld [vmem:[%s2691_s3 + $0x8] sm:$0xff] }
 0x176   :  { %1267 = vmatmul.msk.f32.vlgmr.msrb.gmra.mxu1 %vm650_vm10, %v1966_v30 }
 0x177   :  { %667 = vmatpush.msrb.mxu0 %v503_v38  ;;  %v462_v47 = vmul.f32 %v458_v20, %v456_v31  ;;  %v1998_v31 = vld [vmem:[%s2689_s5 + $0x10] sm:$0xff] }
 0x178   :  { %v534_v11 = vperm.slane %v1998_v31, 6 }
 0x179   :  { %668 = vmatpush.msrb.mxu0 %v499_v39 }
 0x17b   :  { %v1930_v41 = vpop.permute.xlu1 %402  ;;  %v1932_v42 = vpop.permute.xlu0 %435  ;;  %669 = vmatpush.msrb.mxu0 %v1655_v0  ;;  %v611_v0 = vmul.f32 %v1330_v52, %v600_v58 }
 0x17c   :  { %v1935_v45 = vpop.permute.xlu2 %591 }
 0x17d   :  { %v601_v44 = vsel %vm597_vm8, %v588_v49, %v1935_v45  ;;  %670 = vmatpush.msrb.mxu0 %v1573_v63 }
 0x17e   :  { %v615_v15 = vmul.f32 %v1330_v52, %v601_v44  ;;  %v570_v52 = vperm.slane %v1975_v3, 7 }
 0x180   :  { %764 = vmatpush.msrb.mxu3 %v615_v15 }
 0x182   :  { %765 = vmatpush.msrb.mxu3 %v611_v0  ;;  %v574_v0 = vmul.f32 %v570_v52, %v1765_v50 }
 0x183   :  { %v1948_v1 = vpop.permute.xlu1 %322  ;;  %v1950_v6 = vpop.permute.xlu0 %398  ;;  %1271 = vmatmul.msk.f32.vlgmr.msrb.gmra.mxu3 %vm650_vm10, %v1966_v30 }
 0x184   :  { %v1952_v10 = vpop.permute.xlu2 %447 }
 0x185   :  { %v457_v63 = vsel %vm449_vm5, %v1952_v10, %v1932_v42 }
 0x186   :  { %v466_v49 = vmul.f32 %v458_v20, %v457_v63  ;;  %v1993_v20 = vld [vmem:[%s2691_s3 + $0x18] sm:$0xff] }
 0x187   :  { %2699 = vst [vmem:[#allocation4_spill] sm:$0xff] %v1993_v20  ;;  %1268 = vmatmul.msk.f32.gmra.mxu1 %vm650_vm10, %v1993_v20 }
 0x188   :  { %671 = vmatpush.msrb.mxu0 %v466_v49 }
 0x18a   :  { %672 = vmatpush.msrb.mxu0 %v462_v47 }
 0x18b   :  { %v555_v38 = vpop.permute.xlu1 %554  ;;  %v1977_v39 = vpop.permute.xlu0 %365  ;;  %1272 = vmatmul.msk.f32.gmra.mxu3 %vm650_vm10, %v1993_v20 }
 0x18c   :  { %v564_v58 = vsel %vm560_vm9, %v1885_v28, %v555_v38  ;;  %v1987_v44 = vsel %vm375_vm6, %v1916_v2, %v1977_v39  ;;  %v571_v28 = vperm.slane %v1998_v31, 7 }
 0x18d   :  { %v578_v15 = vmul.f32 %v570_v52, %v564_v58  ;;  %v533_v52 = vperm.slane %v1975_v3, 6  ;;  %v2014_v58 = vpop.permute.xlu2 %521 }
 0x18e   :  { %v575_v18 = vmul.f32 %v571_v28, %v1821_v4  ;;  %v538_v4 = vmul.f32 %v534_v11, %v1852_v14 }
 0x18f   :  { %721 = vmatpush.msrb.mxu2 %v578_v15 }
 0x191   :  { %722 = vmatpush.msrb.mxu2 %v574_v0 }
 0x193   :  { %v518_v50 = vpop.permute.xlu1 %517  ;;  %v2005_v63 = vpop.permute.xlu0 %558 }
 0x194   :  { %v527_v49 = vsel %vm523_vm1, %v1887_v29, %v518_v50  ;;  %v562_v47 = vsel %vm560_vm9, %v555_v38, %v2005_v63  ;;  %v525_v0 = vsel %vm523_vm1, %v518_v50, %v2014_v58  ;;  %v2024_v29 = vld [vmem:[%s2691_s3 + $0x28] sm:$0xff]  ;;  %v537_v38 = vmul.f32 %v533_v52, %v1776_v53 }
 0x195   :  { %v579_v15 = vmul.f32 %v571_v28, %v562_v47  ;;  %v541_v20 = vmul.f32 %v533_v52, %v527_v49  ;;  %1273 = vmatmul.msk.f32.gmra.mxu3 %vm650_vm10, %v2024_v29  ;;  %v542_v47 = vmul.f32 %v534_v11, %v525_v0  ;;  %1269 = vmatmul.msk.f32.gmra.mxu1 %vm650_vm10, %v2024_v29  ;;  %v496_v50 = vperm.slane %v1975_v3, 5  ;;  %v2042_v52 = vld [vmem:[%s2691_s3 + $0x38] sm:$0xff]  ;;  %v2052_v14 = vpop.permute.xlu2 %404 }
 0x196   :  { %v455_v11 = vsel %vm449_vm5, %v1932_v42, %v1918_v35 }
 0x197   :  { %779 = vmatpush.msra.mxu1 %v579_v15  ;;  %723 = vmatpush.msrb.mxu2 %v541_v20  ;;  %v459_v15 = vperm.slane %v1975_v3, 3 }
 0x199   :  { %780 = vmatpush.msra.mxu1 %v575_v18  ;;  %724 = vmatpush.msrb.mxu2 %v537_v38  ;;  %v500_v18 = vmul.f32 %v496_v50, %v1796_v21  ;;  %v467_v38 = vmul.f32 %v459_v15, %v455_v11 }
 0x19b   :  { %v481_v28 = vpop.permute.xlu1 %480  ;;  %781 = vmatpush.msra.mxu1 %v542_v47  ;;  %v2036_v53 = vpop.permute.xlu0 %373  ;;  %v418_v47 = vsel %vm412_vm3, %v1950_v6, %v1930_v41 }
 0x19c   :  { %v490_v20 = vsel %vm486_vm4, %v1903_v51, %v481_v28  ;;  %v421_v51 = vperm.slane %v1883_v26, 2 }
 0x19d   :  { %782 = vmatpush.msra.mxu1 %v538_v4  ;;  %v504_v49 = vmul.f32 %v496_v50, %v490_v20  ;;  %1274 = vmatmul.msk.f32.gmra.mxu3 %vm650_vm10, %v2042_v52  ;;  %v627_v50 = vld [vmem:[%s2690_s4 + $0x8] sm:$0xff]  ;;  %v463_v20 = vmul.f32 %v459_v15, %v1760_v48 }
 0x19e   :  { %1270 = vmatmul.msk.f32.gmra.mxu1 %vm650_vm10, %v2042_v52  ;;  %637 = vperm.xlu1 %1327, %v627_v50  }
 0x19f   :  { %725 = vmatpush.msrb.mxu2 %v504_v49  ;;  %v384_v49 = vperm.slane %v1883_v26, 1 }
 0x1a1   :  { %726 = vmatpush.msrb.mxu2 %v500_v18  ;;  %v388_v48 = vmul.f32 %v384_v49, %v1848_v13  ;;  %v568_v13 = vsel %vm560_vm9, %v2005_v63, %v1859_v17  ;;  %v2114_v17 = vld [vmem:[%s2691_s3] sm:$0xff] }
 0x1a3   :  { %v2054_v21 = vpop.permute.xlu1 %410  ;;  %727 = vmatpush.msrb.mxu2 %v1645_v55  ;;  %v383_v55 = vsel %vm375_vm6, %v2036_v53, %v1916_v2  ;;  %v2072_v4 = vpop.permute.xlu0 %334 }
 0x1a4   :  { %v420_v0 = vsel %vm412_vm3, %v2054_v21, %v1950_v6  ;;  %v422_v6 = vperm.slane %v1975_v3, 2  ;;  %v392_v2 = vmul.f32 %v384_v49, %v383_v55  ;;  %v346_v11 = vsel %vm338_vm7, %v2072_v4, %v1948_v1  ;;  %v2097_v55 = vpop.permute.xlu2 %443 }
 0x1a5   :  { %728 = vmatpush.msrb.mxu2 %v1564_v56  ;;  %v429_v42 = vmul.f32 %v421_v51, %v420_v0  ;;  %v425_v56 = vmul.f32 %v421_v51, %v1808_v62  ;;  %v497_v0 = vperm.slane %v1998_v31, 5  ;;  %v347_v62 = vperm.slane %v1883_v26, 0  ;;  %v2091_v51 = vld [vmem:[%s2689_s5 + $0x18] sm:$0xff] }
 0x1a6   :  { %v430_v18 = vmul.f32 %v422_v6, %v418_v47  ;;  %v385_v47 = vperm.slane %v1975_v3, 1 }
 0x1a7   :  { %673 = vmatpush.msrb.mxu0 %v429_v42  ;;  %729 = vmatpush.msrb.mxu2 %v467_v38  ;;  %v426_v38 = vmul.f32 %v422_v6, %v1739_v43  ;;  %v344_v43 = vsel %vm338_vm7, %v1948_v1, %v1927_v32  ;;  %v351_v49 = vmul.f32 %v347_v62, %v1866_v22 }
 0x1a8   :  { %v393_v26 = vmul.f32 %v385_v47, %v1987_v44  ;;  %v389_v44 = vmul.f32 %v385_v47, %v1781_v54  ;;  %v531_v22 = vsel %vm523_vm1, %v2014_v58, %v1878_v25  ;;  %v535_v54 = vperm.slane %v2091_v51, 6  ;;  %v1332_v47 = vld [vmem:[%s2689_s5 + $0x38] ss:$0 sm:$0xff] }
 0x1a9   :  { %674 = vmatpush.msrb.mxu0 %v425_v56  ;;  %730 = vmatpush.msrb.mxu2 %v463_v20  ;;  %v355_v56 = vmul.f32 %v347_v62, %v346_v11  ;;  %v572_v20 = vperm.slane %v2091_v51, 7  ;;  %v460_v25 = vperm.slane %v1998_v31, 3 }
 0x1ab   :  { %v485_v42 = vpop.permute.xlu1 %484  ;;  %675 = vmatpush.msrb.mxu0 %v392_v2  ;;  %731 = vmatpush.msrb.mxu2 %v430_v18  ;;  %v2116_v63 = vpop.permute.xlu0 %369  ;;  %v2120_v6 = vmul.f32 %v572_v20, %v568_v13  ;;  %v2128_v2 = vmul.f32 %v572_v20, %v1826_v5  ;;  %v2141_v5 = vmul.f32 %v535_v54, %v531_v22 }
 0x1ac   :  { %v488_v15 = vsel %vm486_vm4, %v481_v28, %v485_v42  ;;  %v501_v28 = vmul.f32 %v497_v0, %v1830_v7  ;;  %v348_v7 = vperm.slane %v1975_v3, 0  ;;  %v453_v3 = vsel %vm449_vm5, %v1918_v35, %v2097_v55 }
 0x1ad   :  { %v505_v50 = vmul.f32 %v497_v0, %v488_v15  ;;  %676 = vmatpush.msrb.mxu0 %v388_v48  ;;  %732 = vmatpush.msrb.mxu2 %v426_v38  ;;  %v468_v11 = vmul.f32 %v460_v25, %v453_v3  ;;  %v494_v35 = vsel %vm486_vm4, %v485_v42, %v1920_v12  ;;  %v498_v0 = vperm.slane %v2091_v51, 5  ;;  %v2152_v48 = vpop.permute.xlu2 %367 }
 0x1ae   :  { %v356_v1 = vmul.f32 %v348_v7, %v344_v43  ;;  %v352_v58 = vmul.f32 %v348_v7, %v1801_v60  ;;  %v464_v12 = vmul.f32 %v460_v25, %v1876_v24  ;;  %v415_v42 = vsel %vm412_vm3, %v1726_v40, %v2052_v14  ;;  %v1331_v40 = vld [vmem:[%s2689_s5 + $0x30] ss:$0 sm:$0xff] }
 0x1af   :  { %677 = vmatpush.msrb.mxu0 %v355_v56  ;;  %783 = vmatpush.msra.mxu1 %v505_v50  ;;  %v2176_v38 = vmul.f32 %v498_v0, %v1834_v8  ;;  %v379_v24 = vsel %vm375_vm6, %v1977_v39, %v2116_v63  ;;  %v386_v8 = vperm.slane %v1998_v31, 1  ;;  %v424_v25 = vperm.slane %v2091_v51, 2 }
 0x1b0   :  { %733 = vmatpush.msrb.mxu2 %v393_v26  ;;  %v378_v26 = vsel %vm375_vm6, %v1752_v46, %v2152_v48  ;;  %v461_v46 = vperm.slane %v2091_v51, 3 }
 0x1b1   :  { %678 = vmatpush.msrb.mxu0 %v351_v49  ;;  %784 = vmatpush.msra.mxu1 %v501_v28  ;;  %v394_v49 = vmul.f32 %v386_v8, %v379_v24 }
 0x1b2   :  { %734 = vmatpush.msrb.mxu2 %v389_v44  ;;  %679 = vmatmul.f32.vlgmr.msrb.gmra.mxu0 %v2114_v17  ;;  %v465_v3 = vmul.f32 %v461_v46, %v1871_v23  ;;  %v628_v23 = vld [vmem:[%s2690_s4 + $0x10] sm:$0xff] }
 0x1b3   :  { %837 = vmatpush.msra.mxu0 %v2120_v6  ;;  %v2136_v18 = vpop.permute.xlu1 %406  ;;  %785 = vmatpush.msra.mxu1 %v1697_v27  ;;  %v2150_v27 = vmul.f32 %v535_v54, %v1857_v16  ;;  %v423_v16 = vperm.slane %v1998_v31, 2  ;;  %v594_v15 = vpop.permute.xlu0 %593 }
 0x1b4   :  { %735 = vmatpush.msrb.mxu2 %v356_v1  ;;  %v416_v60 = vsel %vm412_vm3, %v1930_v41, %v2136_v18  ;;  %v2171_v41 = vmul.f32 %v498_v0, %v494_v35  ;;  %v598_v20 = vsel %vm597_vm8, %v1783_v57, %v594_v15  ;;  %v390_v57 = vmul.f32 %v386_v8, %v378_v26  ;;  %v624_v35 = vld [vmem:[%s2691_s3 + $0x30] sm:$0xff]  ;;  %v2700_v0 = vld [vmem:[#allocation2_spill] sm:$0xff] }
 0x1b5   :  { %838 = vmatpush.msra.mxu0 %v2128_v2  ;;  %786 = vmatpush.msra.mxu1 %v1601_v19  ;;  %v2163_v19 = vld [vmem:[%s2691_s3 + $0x10] sm:$0xff]  ;;  %v431_v62 = vmul.f32 %v423_v16, %v416_v60  ;;  %v427_v56 = vmul.f32 %v423_v16, %v415_v42  ;;  %v612_v44 = vmul.f32 %v1331_v40, %v598_v20  ;;  %v329_v7 = vpop.permute.xlu2 %328  ;;  %v350_v16 = vperm.slane %v2091_v51, 0  ;;  %v2701_v42 = vld [vmem:[#allocation3_spill] sm:$0xff] }
 0x1b6   :  { %736 = vmatpush.msrb.mxu2 %v352_v58  ;;  %v414_v1 = vsel %vm412_vm3, %v2136_v18, %v2054_v21  ;;  %v341_v58 = vsel %vm338_vm7, %v1792_v59, %v329_v7  ;;  %v413_v21 = vsel %vm412_vm3, %v2052_v14, %v1803_v61  ;;  %v387_v14 = vperm.slane %v2091_v51, 1  ;;  %642 = vperm.xlu2 %1328, %v628_v23  }
 0x1b7   :  { %737 = vmatmul.f32.vlgmr.msrb.gmra.mxu2 %v2114_v17  ;;  %839 = vmatpush.msra.mxu0 %v2141_v5  ;;  %v432_v59 = vmul.f32 %v424_v25, %v414_v1  ;;  %v428_v61 = vmul.f32 %v424_v25, %v413_v21  ;;  %v376_v60 = vsel %vm375_vm6, %v2152_v48, %v2700_v0 }
 0x1b8   :  { %787 = vmatpush.msra.mxu1 %v468_v11  ;;  %v339_v48 = vsel %vm338_vm7, %v329_v7, %v2701_v42 }
 0x1b9   :  { %840 = vmatpush.msra.mxu0 %v2150_v27 }
 0x1ba   :  { %788 = vmatpush.msra.mxu1 %v464_v12  ;;  %682 = vmatmul.f32.gmra.mxu0 %v2163_v19  ;;  %v391_v12 = vmul.f32 %v387_v14, %v376_v60 }
 0x1bb   :  { %841 = vmatpush.msra.mxu0 %v2171_v41  ;;  %v596_v50 = vpop.permute.xlu1 %595  ;;  %v2291_v51 = vpop.permute.xlu0 %632 }
 0x1bc   :  { %v599_v13 = vsel %vm597_vm8, %v1935_v45, %v596_v50  ;;  %v605_v39 = vsel %vm597_vm8, %v596_v50, %v1894_v33  ;;  %789 = vmatpush.msra.mxu1 %v431_v62  ;;  %v604_v45 = vsel %vm597_vm8, %v594_v15, %v1713_v36  ;;  %v451_v33 = vsel %vm449_vm5, %v2097_v55, %v1952_v10  ;;  %v2217_v36 = vld [vmem:[%s2691_s3 + $0x20] sm:$0xff]  ;;  %v2702_v62 = vld [vmem:[#allocation4_spill] sm:$0xff] }
 0x1bd   :  { %v616_v28 = vmul.f32 %v1331_v40, %v599_v13  ;;  %v617_v43 = vmul.f32 %v1332_v47, %v605_v39  ;;  %842 = vmatpush.msra.mxu0 %v2176_v38  ;;  %v613_v22 = vmul.f32 %v1332_v47, %v604_v45  ;;  %v469_v10 = vmul.f32 %v461_v46, %v451_v33 }
 0x1be   :  { %790 = vmatpush.msra.mxu1 %v427_v56  ;;  %v349_v55 = vperm.slane %v1998_v31, 0 }
 0x1bf   :  { %740 = vmatmul.f32.gmra.mxu2 %v2163_v19  ;;  %843 = vmatpush.msra.mxu0 %v1716_v37 }
 0x1c0   :  { %791 = vmatpush.msra.mxu1 %v394_v49  ;;  %822 = vmatpush.msra.mxu3 %v616_v28  ;;  %v353_v11 = vmul.f32 %v349_v55, %v341_v58 }
 0x1c1   :  { %880 = vmatpush.msra.mxu2 %v617_v43  ;;  %844 = vmatpush.msra.mxu0 %v1617_v34 }
 0x1c2   :  { %792 = vmatpush.msra.mxu1 %v390_v57  ;;  %823 = vmatpush.msra.mxu3 %v612_v44 }
 0x1c3   :  { %881 = vmatpush.msra.mxu2 %v613_v22  ;;  %685 = vmatmul.f32.gmra.mxu0 %v2217_v36  ;;  %v331_v54 = vpop.permute.xlu1 %330 }
 0x1c4   :  { %845 = vmatpush.msra.mxu0 %v469_v10  ;;  %1315 = vmatpush.msrb.mxu3 %v617_v43  ;;  %v342_v31 = vsel %vm338_vm7, %v1927_v32, %v331_v54  ;;  %v377_v32 = vsel %vm375_vm6, %v2116_v63, %v2036_v53  ;;  %v340_v63 = vsel %vm338_vm7, %v331_v54, %v2072_v4 }
 0x1c5   :  { %v357_v18 = vmul.f32 %v349_v55, %v342_v31  ;;  %1275 = vmatmul.msk.f32.vlgmr.msra.gmra.mxu3 %vm650_vm10, %v1966_v30  ;;  %v395_v53 = vmul.f32 %v387_v14, %v377_v32  ;;  %v358_v15 = vmul.f32 %v350_v16, %v340_v63  ;;  %v354_v4 = vmul.f32 %v350_v16, %v339_v48 }
 0x1c6   :  { %846 = vmatpush.msra.mxu0 %v465_v3  ;;  %1316 = vmatpush.msrb.mxu3 %v613_v22 }
 0x1c7   :  { %743 = vmatmul.f32.gmra.mxu2 %v2217_v36  ;;  %793 = vmatpush.msra.mxu1 %v357_v18 }
 0x1c8   :  { %847 = vmatpush.msra.mxu0 %v432_v59 }
 0x1c9   :  { %794 = vmatpush.msra.mxu1 %v353_v11 }
 0x1ca   :  { %848 = vmatpush.msra.mxu0 %v428_v61  ;;  %795 = vmatmul.f32.vlgmr.msra.gmra.mxu1 %v2114_v17 }
 0x1cb   :  { %688 = vmatmul.f32.gmra.mxu0 %v624_v35  ;;  %1299 = vmatpush.msrb.mxu1 %v2120_v6 }
 0x1cc   :  { %849 = vmatpush.msra.mxu0 %v395_v53 }
 0x1cd   :  { %1300 = vmatpush.msrb.mxu1 %v2128_v2  ;;  %1276 = vmatmul.msk.f32.gmra.mxu3 %vm650_vm10, %v2702_v62 }
 0x1ce   :  { %850 = vmatpush.msra.mxu0 %v391_v12 }
 0x1cf   :  { %746 = vmatmul.f32.gmra.mxu2 %v624_v35  ;;  %1301 = vmatpush.msrb.mxu1 %v2141_v5 }
 0x1d0   :  { %851 = vmatpush.msra.mxu0 %v358_v15 }
 0x1d1   :  { %1302 = vmatpush.msrb.mxu1 %v2150_v27 }
 0x1d2   :  { %852 = vmatpush.msra.mxu0 %v354_v4  ;;  %798 = vmatmul.f32.gmra.mxu1 %v2163_v19 }
 0x1d3   :  { %1303 = vmatpush.msrb.mxu1 %v2171_v41  ;;  %853 = vmatmul.f32.vlgmr.msra.gmra.mxu0 %v2114_v17 }
 0x1d5   :  { %1304 = vmatpush.msrb.mxu1 %v2176_v38  ;;  %1277 = vmatmul.msk.f32.gmra.mxu3 %vm650_vm10, %v2024_v29 }
 0x1d7   :  { %1305 = vmatpush.msrb.mxu1 %v1716_v37  ;;  %1279 = vmatmul.msk.f32.vlgmr.msra.gmra.mxu2 %vm650_vm10, %v1966_v30 }
 0x1d9   :  { %1306 = vmatpush.msrb.mxu1 %v1617_v34 }
 0x1da   :  { %801 = vmatmul.f32.gmra.mxu1 %v2217_v36 }
 0x1db   :  { %1307 = vmatpush.msrb.mxu1 %v469_v10  ;;  %856 = vmatmul.f32.gmra.mxu0 %v2163_v19  ;;  %v2322_v10 = vpop.permute.xlu0 %647 }
 0x1dd   :  { %1308 = vmatpush.msrb.mxu1 %v465_v3  ;;  %1278 = vmatmul.msk.f32.gmra.mxu3 %vm650_vm10, %v2042_v52 }
 0x1df   :  { %1309 = vmatpush.msrb.mxu1 %v432_v59  ;;  %1280 = vmatmul.msk.f32.gmra.mxu2 %vm650_vm10, %v2702_v62 }
 0x1e1   :  { %1310 = vmatpush.msrb.mxu1 %v428_v61 }
 0x1e2   :  { %804 = vmatmul.f32.gmra.mxu1 %v624_v35 }
 0x1e3   :  { %1311 = vmatpush.msrb.mxu1 %v395_v53  ;;  %859 = vmatmul.f32.gmra.mxu0 %v2217_v36 }
 0x1e5   :  { %1312 = vmatpush.msrb.mxu1 %v391_v12  ;;  %1282 = vmatmul.msk.f32.vlgmr.msrb.gmra.mxu3 %vm650_vm10, %v2042_v52 }
 0x1e7   :  { %1313 = vmatpush.msrb.mxu1 %v358_v15  ;;  %1281 = vmatmul.msk.f32.gmra.mxu2 %vm650_vm10, %v2024_v29 }
 0x1e9   :  { %1314 = vmatpush.msrb.mxu1 %v354_v4 }
 0x1ea   :  { %862 = vmatmul.f32.vlgmr.msrb.gmra.mxu1 %v624_v35 }
 0x1f3   :  { %v709_v34 = vpop.f32.mrf.mxu1 }
 0x204   :  { %v712_v37 = vpop.f32.mrf.mxu1 }
 0x206   :  { %v767_v9 = vpop.f32.mrf.mxu3 }
 0x20e   :  { %v770_v30 = vpop.f32.mrf.mxu3 }
 0x210   :  { %v2299_v19 = vpop.permute.xlu1 %637  ;;  %v2308_v39 = vpop.permute.xlu2 %642 }
 0x212   :  { %v715_v5 = vpop.f32.mrf.mxu1 }
 0x218   :  { %v2297_v27 = vpop.f32.mrf.mxu3 }
 0x21b   :  { %v718_v13 = vpop.f32.mrf.mxu1 }
 0x220   :  { %v2310_v26 = vpop.f32.mrf.mxu3 }
 0x22f   :  { %v680_v17 = vpop.f32.mrf.mxu0 }
 0x230   :  { %v681_v6 = vadd.f32 %v680_v17, %v2291_v51 }
 0x232   :  { %v2294_v2 = vadd.f32 %v709_v34, %v681_v6 }
 0x234   :  { %v1283_v52 = vmul.f32 -1.442695, %v2294_v2 }
 0x236   :  { %1365 = vpow2.f32 %v1283_v52 }
 0x237   :  { %v683_v29 = vpop.f32.mrf.mxu0 }
 0x238   :  { %v684_v41 = vadd.f32 %v683_v29, %v2299_v19 }
 0x23a   :  { %v2302_v38 = vadd.f32 %v712_v37, %v684_v41  ;;  %v738_v24 = vpop.f32.mrf.mxu2 }
 0x23b   :  { %v739_v40 = vadd.f32 %v738_v24, %v2291_v51  ;;  %v1429_v24 = vld [vmem:[%s2686_s0] sm:$0xff] }
 0x23c   :  { %v1366_v47 = vpop.eup %1365  ;;  %v1287_v50 = vmul.f32 -1.442695, %v2302_v38 }
 0x23d   :  { %v943_v56 = vadd.f32 1.0, %v1366_v47  ;;  %v2306_v8 = vadd.f32 %v767_v9, %v739_v40 }
 0x23e   :  { %1367 = vpow2.f32 %v1287_v50 }
 0x23f   :  { %1369 = vrcp.f32 %v943_v56  ;;  %v1284_v20 = vmul.f32 -1.442695, %v2306_v8  ;;  %v968_v21 = vand.u32 2147483647, %v943_v56  ;;  %v970_v18 = vand.u32 2147483648, %v943_v56 }
 0x240   :  { %v686_v28 = vpop.f32.mrf.mxu0  ;;  %vm964_vm11 = vweird.f32 %v943_v56 }
 0x241   :  { %v687_v43 = vadd.f32 %v686_v28, %v2308_v39  ;;  %1371 = vpow2.f32 %v1284_v20  ;;  %vm969_vm13 = vcmp.eq.f32.partialorder %v968_v21, 8.507059e+37  ;;  %v971_v63 = vor.u32 1.1754944e-38, %v970_v18 }
 0x242   :  { %v741_v49 = vpop.f32.mrf.mxu2 }
 0x243   :  { %v2314_v45 = vadd.f32 %v715_v5, %v687_v43  ;;  %v742_v33 = vadd.f32 %v741_v49, %v2299_v19 }
 0x244   :  { %v1368_v46 = vpop.eup %1367 }
 0x245   :  { %v1370_v57 = vpop.eup %1369  ;;  %v2317_v44 = vadd.f32 1.0, %v1368_v46  ;;  %v1291_v36 = vmul.f32 -1.442695, %v2314_v45  ;;  %v2320_v7 = vadd.f32 %v770_v30, %v742_v33 }
 0x246   :  { %v960_v22 = vmul.f32 %v1370_v57, %v943_v56  ;;  %vm965_vm9 = vweird.f32 %v1370_v57 }
 0x247   :  { %1373 = vrcp.f32 %v2317_v44  ;;  %v796_v55 = vpop.f32.mrf.mxu1  ;;  %v1372_v1 = vpop.eup %1371  ;;  %v1288_v3 = vmul.f32 -1.442695, %v2320_v7  ;;  %vm966_vm12 = vmor %vm964_vm11, %vm965_vm9  ;;  %v1028_v12 = vand.u32 2147483647, %v2317_v44  ;;  %v1030_v16 = vand.u32 2147483648, %v2317_v44 }
 0x248   :  { %v961_v54 = vsub.f32 1.0, %v960_v22  ;;  %1375 = vpow2.f32 %v1291_v36  ;;  %v689_v25 = vpop.f32.mrf.mxu0  ;;  %v797_v58 = vadd.f32 %v796_v55, %v2291_v51  ;;  %v825_v31 = vpop.f32.mrf.mxu3  ;;  %v2327_v23 = vadd.f32 1.0, %v1372_v1 }
 0x249   :  { %v690_v59 = vadd.f32 %v689_v25, %v2322_v10  ;;  %1377 = vpow2.f32 %v1288_v3  ;;  %vm1024_vm14 = vweird.f32 %v2317_v44  ;;  %vm2349_vm15 = vcmp.eq.f32.partialorder %v1028_v12, 8.507059e+37 }
 0x24a   :  { %v962_v32 = vmul.f32 %v1370_v57, %v961_v54  ;;  %v744_v11 = vpop.f32.mrf.mxu2  ;;  %v2330_v61 = vadd.f32 %v825_v31, %v797_v58  ;;  %1379 = vrcp.f32 %v2327_v23  ;;  %v983_v6 = vand.u32 2147483647, %v2327_v23 }
 0x24b   :  { %v2333_v35 = vadd.f32 %v718_v13, %v690_v59  ;;  %v745_v0 = vadd.f32 %v744_v11, %v2308_v39  ;;  %v1031_v29 = vor.u32 1.1754944e-38, %v1030_v16  ;;  %v985_v41 = vand.u32 2147483648, %v2327_v23 }
 0x24c   :  { %v963_v14 = vadd.f32 %v1370_v57, %v962_v32  ;;  %v1285_v60 = vmul.f32 -1.442695, %v2330_v61  ;;  %vm979_vm1 = vweird.f32 %v2327_v23  ;;  %vm2367_vm2 = vcmp.eq.f32.partialorder %v983_v6, 8.507059e+37 }
 0x24d   :  { %v1374_v53 = vpop.eup %1373  ;;  %v1295_v15 = vmul.f32 -1.442695, %v2333_v35  ;;  %v2345_v9 = vadd.f32 %v2297_v27, %v745_v0  ;;  %v986_v36 = vor.u32 1.1754944e-38, %v985_v41  ;;  %v1431_v41 = vld [vmem:[%s2686_s0 + $0x8] sm:$0xff] }
 0x24e   :  { %v1376_v42 = vpop.eup %1375  ;;  %v967_v48 = vsel %vm966_vm12, %v1370_v57, %v963_v14  ;;  %v1020_v62 = vmul.f32 %v1374_v53, %v2317_v44  ;;  %1381 = vpow2.f32 %v1285_v60  ;;  %vm1025_vm0 = vweird.f32 %v1374_v53 }
 0x24f   :  { %v972_v4 = vsel %vm969_vm13, %v971_v63, %v967_v48  ;;  %v2342_v34 = vadd.f32 1.0, %v1376_v42  ;;  %v1378_v37 = vpop.eup %1377  ;;  %1383 = vpow2.f32 %v1295_v15  ;;  %v799_v27 = vpop.f32.mrf.mxu1  ;;  %v1292_v20 = vmul.f32 -1.442695, %v2345_v9  ;;  %vm1026_vm3 = vmor %vm1024_vm14, %vm1025_vm0 }
 0x250   :  { %v1199_v30 = vmul.f32 %v972_v4, %v2294_v2  ;;  %v1021_v17 = vsub.f32 1.0, %v1020_v62  ;;  %v1380_v5 = vpop.eup %1379  ;;  %v2361_v13 = vadd.f32 1.0, %v1378_v37  ;;  %v2372_v46 = vpop.f32.mrf.mxu3  ;;  %v800_v22 = vadd.f32 %v799_v27, %v2299_v19 }
 0x251   :  { %1385 = vrcp.f32 %v2342_v34  ;;  %v975_v47 = vmul.f32 %v1380_v5, %v2327_v23  ;;  %v1090_v56 = vand.u32 2147483648, %v2342_v34  ;;  %v1088_v33 = vand.u32 2147483647, %v2342_v34  ;;  %v854_v25 = vpop.f32.mrf.mxu0 }
 0x252   :  { %v1215_v2 = vadd.f32 %v1429_v24, %v1199_v30  ;;  %v1022_v40 = vmul.f32 %v1374_v53, %v1021_v17  ;;  %v747_v50 = vpop.f32.mrf.mxu2  ;;  %vm980_vm4 = vweird.f32 %v1380_v5  ;;  %1387 = vrcp.f32 %v2361_v13 }
 0x253   :  { %v976_v43 = vsub.f32 1.0, %v975_v47  ;;  %1389 = vpow2.f32 %v1292_v20  ;;  %vm1084_vm5 = vweird.f32 %v2342_v34  ;;  %v1091_v44 = vor.u32 1.1754944e-38, %v1090_v56  ;;  %vm981_vm7 = vmor %vm979_vm1, %vm980_vm4 }
 0x254   :  { %1231 = vst [vmem:[%s2692_s6] sm:$0xff] %v1215_v2  ;;  %v1023_v28 = vadd.f32 %v1374_v53, %v1022_v40  ;;  %v1382_v57 = vpop.eup %1381  ;;  %vm2387_vm6 = vcmp.eq.f32.partialorder %v1088_v33, 8.507059e+37  ;;  %v1043_v14 = vand.u32 2147483647, %v2361_v13  ;;  %v1045_v0 = vand.u32 2147483648, %v2361_v13 }
 0x255   :  { %v1384_v55 = vpop.eup %1383  ;;  %v977_v54 = vmul.f32 %v1380_v5, %v976_v43  ;;  %v2378_v3 = vadd.f32 1.0, %v1382_v57  ;;  %vm1039_vm10 = vweird.f32 %v2361_v13 }
 0x256   :  { %v1027_v1 = vsel %vm1026_vm3, %v1374_v53, %v1023_v28  ;;  %v2383_v21 = vadd.f32 1.0, %v1384_v55  ;;  %v1430_v53 = vld [vmem:[%s2686_s0 + $0x20] sm:$0xff]  ;;  %vm2416_vm9 = vcmp.eq.f32.partialorder %v1043_v14, 8.507059e+37  ;;  %v2442_v28 = vadd.f32 %v2372_v46, %v800_v22 }
 0x257   :  { %v1386_v58 = vpop.eup %1385  ;;  %v1032_v31 = vsel %vm2349_vm15, %v1031_v29, %v1027_v1  ;;  %v978_v59 = vadd.f32 %v1380_v5, %v977_v54  ;;  %v802_v62 = vpop.f32.mrf.mxu1  ;;  %v998_v2 = vand.u32 2147483647, %v2378_v3  ;;  %vm994_vm14 = vweird.f32 %v2378_v3 }
 0x258   :  { %v1203_v18 = vmul.f32 %v1032_v31, %v2302_v38  ;;  %v1080_v32 = vmul.f32 %v1386_v58, %v2342_v34  ;;  %1391 = vrcp.f32 %v2383_v21  ;;  %v1150_v60 = vand.u32 2147483648, %v2383_v21  ;;  %v1388_v42 = vpop.eup %1387  ;;  %v831_v40 = vpop.f32.mrf.mxu3 }
 0x259   :  { %v2399_v38 = vadd.f32 %v854_v25, %v2291_v51  ;;  %v982_v12 = vsel %vm981_vm7, %v1380_v5, %v978_v59  ;;  %1393 = vrcp.f32 %v2378_v3  ;;  %vm1085_vm8 = vweird.f32 %v1386_v58  ;;  %v1390_v15 = vpop.eup %1389  ;;  %v2430_v47 = vpop.f32.mrf.mxu0 }
 0x25a   :  { %v1219_v63 = vadd.f32 %v1430_v53, %v1203_v18  ;;  %v1081_v16 = vsub.f32 1.0, %v1080_v32  ;;  %v2405_v23 = vpop.f32.mrf.mxu2  ;;  %v987_v48 = vsel %vm2367_vm2, %v986_v36, %v982_v12  ;;  %v748_v51 = vadd.f32 %v747_v50, %v2322_v10  ;;  %vm1086_vm13 = vmor %vm1084_vm5, %vm1085_vm8 }
 0x25b   :  { %v1200_v4 = vmul.f32 %v987_v48, %v2306_v8  ;;  %v1035_v30 = vmul.f32 %v1388_v42, %v2361_v13  ;;  %v1148_v6 = vand.u32 2147483647, %v2383_v21  ;;  %vm1040_vm11 = vweird.f32 %v1388_v42 }
 0x25c   :  { %1235 = vst [vmem:[%s2692_s6 + $0x20] sm:$0xff] %v1219_v63  ;;  %v1082_v37 = vmul.f32 %v1386_v58, %v1081_v16  ;;  %v1046_v5 = vor.u32 1.1754944e-38, %v1045_v0  ;;  %v2421_v52 = vor.u32 1.1754944e-38, %v1150_v60  ;;  %v2423_v29 = vadd.f32 1.0, %v1390_v15  ;;  %vm1041_vm2 = vmor %vm1039_vm10, %vm1040_vm11 }
 0x25d   :  { %v1216_v8 = vadd.f32 %v1431_v41, %v1200_v4  ;;  %v1036_v24 = vsub.f32 1.0, %v1035_v30  ;;  %vm1144_vm12 = vweird.f32 %v2383_v21  ;;  %v1000_v56 = vand.u32 2147483648, %v2378_v3 }
 0x25e   :  { %v1083_v27 = vadd.f32 %v1386_v58, %v1082_v37  ;;  %v1392_v50 = vpop.eup %1391  ;;  %1395 = vrcp.f32 %v2423_v29  ;;  %v2439_v20 = vadd.f32 %v2310_v26, %v748_v51  ;;  %vm2448_vm15 = vcmp.eq.f32.partialorder %v1148_v6, 8.507059e+37 }
 0x25f   :  { %v1394_v43 = vpop.eup %1393  ;;  %1232 = vst [vmem:[%s2692_s6 + $0x8] sm:$0xff] %v1216_v8  ;;  %v1037_v34 = vmul.f32 %v1388_v42, %v1036_v24  ;;  %v1140_v33 = vmul.f32 %v1392_v50, %v2383_v21  ;;  %v1103_v36 = vand.u32 2147483647, %v2423_v29  ;;  %vm1145_vm0 = vweird.f32 %v1392_v50  ;;  %v805_v63 = vpop.f32.mrf.mxu1 }
 0x260   :  { %v1087_v49 = vsel %vm1086_vm13, %v1386_v58, %v1083_v27  ;;  %v1105_v46 = vand.u32 2147483648, %v2423_v29  ;;  %v990_v22 = vmul.f32 %v1394_v43, %v2378_v3  ;;  %vm995_vm1 = vweird.f32 %v1394_v43  ;;  %v834_v30 = vpop.f32.mrf.mxu3  ;;  %v1436_v58 = vld [vmem:[%s2686_s0 + $0x48] sm:$0xff] }
 0x261   :  { %v1092_v26 = vsel %vm2387_vm6, %v1091_v44, %v1087_v49  ;;  %v1038_v1 = vadd.f32 %v1388_v42, %v1037_v34  ;;  %v1141_v54 = vsub.f32 1.0, %v1140_v33  ;;  %vm2461_vm3 = vcmp.eq.f32.partialorder %v998_v2, 8.507059e+37  ;;  %vm1146_vm6 = vmor %vm1144_vm12, %vm1145_vm0  ;;  %v860_v17 = vpop.f32.mrf.mxu0 }
 0x262   :  { %v1207_v55 = vmul.f32 %v1092_v26, %v2314_v45  ;;  %v991_v25 = vsub.f32 1.0, %v990_v22  ;;  %v1001_v31 = vor.u32 1.1754944e-38, %v1000_v56  ;;  %v1296_v44 = vmul.f32 -1.442695, %v2439_v20  ;;  %v886_v18 = vpop.f32.mrf.mxu2  ;;  %v1432_v45 = vld [vmem:[%s2686_s0 + $0x40] sm:$0xff]  ;;  %vm996_vm7 = vmor %vm994_vm14, %vm995_vm1 }
 0x263   :  { %v1042_v32 = vsel %vm1041_vm2, %v1388_v42, %v1038_v1  ;;  %v1142_v11 = vmul.f32 %v1392_v50, %v1141_v54  ;;  %vm1099_vm4 = vweird.f32 %v2423_v29  ;;  %v1289_v13 = vmul.f32 -1.442695, %v2442_v28 }
 0x264   :  { %v1223_v59 = vadd.f32 %v1432_v45, %v1207_v55  ;;  %v1396_v14 = vpop.eup %1395  ;;  %v1047_v0 = vsel %vm2416_vm9, %v1046_v5, %v1042_v32  ;;  %v992_v60 = vmul.f32 %v1394_v43, %v991_v25  ;;  %1397 = vpow2.f32 %v1296_v44 }
 0x265   :  { %v803_v53 = vadd.f32 %v802_v62, %v2308_v39  ;;  %v1204_v12 = vmul.f32 %v1047_v0, %v2320_v7  ;;  %v1143_v16 = vadd.f32 %v1392_v50, %v1142_v11  ;;  %v1095_v42 = vmul.f32 %v1396_v14, %v2423_v29  ;;  %v1433_v7 = vld [vmem:[%s2686_s0 + $0x28] sm:$0xff] }
 0x266   :  { %1239 = vst [vmem:[%s2692_s6 + $0x40] sm:$0xff] %v1223_v59  ;;  %vm1100_vm5 = vweird.f32 %v1396_v14  ;;  %v993_v48 = vadd.f32 %v1394_v43, %v992_v60  ;;  %1399 = vpow2.f32 %v1289_v13  ;;  %v2486_v62 = vadd.f32 %v2405_v23, %v2399_v38 }
 0x267   :  { %v2482_v51 = vadd.f32 %v831_v40, %v803_v53  ;;  %v1220_v15 = vadd.f32 %v1433_v7, %v1204_v12  ;;  %v1147_v4 = vsel %vm1146_vm6, %v1392_v50, %v1143_v16  ;;  %v1096_v37 = vsub.f32 1.0, %v1095_v42  ;;  %v1434_v50 = vld [vmem:[%s2686_s0 + $0x60] sm:$0xff]  ;;  %vm1101_vm8 = vmor %vm1099_vm4, %vm1100_vm5 }
 0x268   :  { %v806_v21 = vadd.f32 %v805_v63, %v2322_v10  ;;  %v1152_v38 = vsel %vm2448_vm15, %v2421_v52, %v1147_v4  ;;  %v997_v23 = vsel %vm996_vm7, %v1394_v43, %v993_v48  ;;  %v1286_v5 = vmul.f32 -1.442695, %v2486_v62  ;;  %v892_v60 = vpop.f32.mrf.mxu3 }
 0x269   :  { %v1293_v6 = vmul.f32 -1.442695, %v2482_v51  ;;  %1236 = vst [vmem:[%s2692_s6 + $0x28] sm:$0xff] %v1220_v15  ;;  %v1211_v3 = vmul.f32 %v1152_v38, %v2333_v35  ;;  %v1097_v41 = vmul.f32 %v1396_v14, %v1096_v37  ;;  %v1002_v8 = vsel %vm2461_vm3, %v1001_v31, %v997_v23 }
 0x26a   :  { %v858_v27 = vadd.f32 %v2430_v47, %v2299_v19  ;;  %v1398_v24 = vpop.eup %1397  ;;  %v1201_v52 = vmul.f32 %v1002_v8, %v2330_v61  ;;  %v2509_v2 = vadd.f32 %v834_v30, %v806_v21  ;;  %v861_v40 = vadd.f32 %v860_v17, %v2308_v39  ;;  %v1435_v61 = vld [vmem:[%s2686_s0 + $0x10] sm:$0xff]  ;;  %v889_v33 = vpop.f32.mrf.mxu2 }
 0x26b   :  { %1401 = vpow2.f32 %v1293_v6  ;;  %v1227_v35 = vadd.f32 %v1434_v50, %v1211_v3  ;;  %v1098_v56 = vadd.f32 %v1396_v14, %v1097_v41  ;;  %v2515_v43 = vadd.f32 1.0, %v1398_v24 }
 0x26c   :  { %1403 = vpow2.f32 %v1286_v5  ;;  %v1400_v49 = vpop.eup %1399  ;;  %v1106_v19 = vor.u32 1.1754944e-38, %v1105_v46  ;;  %v1217_v39 = vadd.f32 %v1435_v61, %v1201_v52  ;;  %v1297_v47 = vmul.f32 -1.442695, %v2509_v2 }
 0x26d   :  { %v2524_v34 = vadd.f32 %v886_v18, %v858_v27  ;;  %1243 = vst [vmem:[%s2692_s6 + $0x60] sm:$0xff] %v1227_v35  ;;  %v1102_v57 = vsel %vm1101_vm8, %v1396_v14, %v1098_v56  ;;  %vm1104_vm10 = vcmp.eq.f32.partialorder %v1103_v36, 8.507059e+37  ;;  %1405 = vrcp.f32 %v2515_v43  ;;  %v863_v36 = vpop.f32.mrf.mxu1 }
 0x26e   :  { %v1107_v26 = vsel %vm1104_vm10, %v1106_v19, %v1102_v57  ;;  %1233 = vst [vmem:[%s2692_s6 + $0x10] sm:$0xff] %v1217_v39  ;;  %v2535_v46 = vadd.f32 1.0, %v1400_v49  ;;  %1407 = vpow2.f32 %v1297_v47  ;;  %v2539_v1 = vadd.f32 %v889_v33, %v861_v40 }
 0x26f   :  { %v1208_v22 = vmul.f32 %v1107_v26, %v2345_v9  ;;  %v1290_v55 = vmul.f32 -1.442695, %v2524_v34  ;;  %v1163_v29 = vand.u32 2147483647, %v2515_v43  ;;  %v1165_v44 = vand.u32 2147483648, %v2515_v43 }
 0x270   :  { %1409 = vrcp.f32 %v2535_v46  ;;  %v1294_v45 = vmul.f32 -1.442695, %v2539_v1  ;;  %v1058_v32 = vand.u32 2147483647, %v2535_v46  ;;  %v1060_v11 = vand.u32 2147483648, %v2535_v46 }
 0x271   :  { %v1402_v54 = vpop.eup %1401  ;;  %v1224_v31 = vadd.f32 %v1436_v58, %v1208_v22  ;;  %1411 = vpow2.f32 %v1290_v55  ;;  %v864_v13 = vadd.f32 %v863_v36, %v2322_v10  ;;  %vm1159_vm9 = vweird.f32 %v2515_v43 }
 0x272   :  { %v1404_v25 = vpop.eup %1403  ;;  %v2547_v18 = vadd.f32 1.0, %v1402_v54  ;;  %vm2562_vm11 = vcmp.eq.f32.partialorder %v1163_v29, 8.507059e+37  ;;  %v1166_v63 = vor.u32 1.1754944e-38, %v1165_v44  ;;  %vm1054_vm12 = vweird.f32 %v2535_v46  ;;  %v1437_v29 = vld [vmem:[%s2686_s0 + $0x68] sm:$0xff] }
 0x273   :  { %v2549_v9 = vadd.f32 1.0, %v1404_v25  ;;  %v1406_v59 = vpop.eup %1405  ;;  %1240 = vst [vmem:[%s2692_s6 + $0x48] sm:$0xff] %v1224_v31  ;;  %vm2571_vm13 = vcmp.eq.f32.partialorder %v1058_v32, 8.507059e+37  ;;  %v1061_v4 = vor.u32 1.1754944e-38, %v1060_v11  ;;  %v2576_v21 = vadd.f32 %v892_v60, %v864_v13 }
 0x274   :  { %1413 = vrcp.f32 %v2547_v18  ;;  %v1408_v14 = vpop.eup %1407  ;;  %v1155_v0 = vmul.f32 %v1406_v59, %v2515_v43  ;;  %v1118_v42 = vand.u32 2147483647, %v2547_v18  ;;  %v1120_v37 = vand.u32 2147483648, %v2547_v18 }
 0x275   :  { %1415 = vrcp.f32 %v2549_v9  ;;  %v2568_v10 = vadd.f32 1.0, %v1408_v14  ;;  %vm1160_vm14 = vweird.f32 %v1406_v59  ;;  %v1013_v17 = vand.u32 2147483647, %v2549_v9 }
 0x276   :  { %v1410_v12 = vpop.eup %1409  ;;  %v1156_v16 = vsub.f32 1.0, %v1155_v0  ;;  %1417 = vpow2.f32 %v1294_v45  ;;  %vm1114_vm15 = vweird.f32 %v2547_v18  ;;  %v1015_v6 = vand.u32 2147483648, %v2549_v9  ;;  %vm1161_vm2 = vmor %vm1159_vm9, %vm1160_vm14 }
 0x277   :  { %v1412_v48 = vpop.eup %1411  ;;  %v1050_v7 = vmul.f32 %v1410_v12, %v2535_v46  ;;  %1419 = vrcp.f32 %v2568_v10  ;;  %vm2585_vm0 = vcmp.eq.f32.partialorder %v1118_v42, 8.507059e+37  ;;  %vm1009_vm1 = vweird.f32 %v2549_v9 }
 0x278   :  { %v1157_v30 = vmul.f32 %v1406_v59, %v1156_v16  ;;  %v2582_v5 = vadd.f32 1.0, %v1412_v48  ;;  %vm1055_vm3 = vweird.f32 %v1410_v12  ;;  %v1121_v52 = vor.u32 1.1754944e-38, %v1120_v37  ;;  %v1439_v16 = vld [vmem:[%s2686_s0 + $0x50] sm:$0xff] }
 0x279   :  { %v1051_v23 = vsub.f32 1.0, %v1050_v7  ;;  %vm2593_vm4 = vcmp.eq.f32.partialorder %v1013_v17, 8.507059e+37  ;;  %v1016_v39 = vor.u32 1.1754944e-38, %v1015_v6  ;;  %vm1056_vm5 = vmor %vm1054_vm12, %vm1055_vm3  ;;  %v1178_v46 = vand.u32 2147483647, %v2568_v10  ;;  %v1440_v7 = vld [vmem:[%s2686_s0 + $0x18] sm:$0xff] }
 0x27a   :  { %v1414_v38 = vpop.eup %1413  ;;  %v1158_v41 = vadd.f32 %v1406_v59, %v1157_v30  ;;  %1421 = vrcp.f32 %v2582_v5  ;;  %v1180_v45 = vand.u32 2147483648, %v2568_v10  ;;  %v1073_v17 = vand.u32 2147483647, %v2582_v5 }
 0x27b   :  { %v1416_v3 = vpop.eup %1415  ;;  %v1110_v8 = vmul.f32 %v1414_v38, %v2547_v18  ;;  %v1052_v24 = vmul.f32 %v1410_v12, %v1051_v23  ;;  %vm1115_vm6 = vweird.f32 %v1414_v38  ;;  %v1438_v18 = vld [vmem:[%s2686_s0 + $0x30] sm:$0xff] }
 0x27c   :  { %v1005_v40 = vmul.f32 %v1416_v3, %v2549_v9  ;;  %v1418_v50 = vpop.eup %1417  ;;  %v1162_v35 = vsel %vm1161_vm2, %v1406_v59, %v1158_v41  ;;  %vm1010_vm7 = vweird.f32 %v1416_v3  ;;  %vm1116_vm8 = vmor %vm1114_vm15, %vm1115_vm6  ;;  %vm1069_vm15 = vweird.f32 %v2582_v5 }
 0x27d   :  { %v1111_v56 = vsub.f32 1.0, %v1110_v8  ;;  %v1167_v19 = vsel %vm2562_vm11, %v1166_v63, %v1162_v35  ;;  %v1053_v61 = vadd.f32 %v1410_v12, %v1052_v24  ;;  %v1420_v47 = vpop.eup %1419  ;;  %v2603_v26 = vadd.f32 1.0, %v1418_v50  ;;  %vm1011_vm10 = vmor %vm1009_vm1, %vm1010_vm7 }
 0x27e   :  { %v1006_v43 = vsub.f32 1.0, %v1005_v40  ;;  %v1212_v33 = vmul.f32 %v1167_v19, %v2439_v20  ;;  %v1170_v54 = vmul.f32 %v1420_v47, %v2568_v10  ;;  %vm1175_vm9 = vweird.f32 %v1420_v47  ;;  %v1442_v19 = vld [vmem:[%s2686_s0 + $0x38] sm:$0xff] }
 0x27f   :  { %v1112_v57 = vmul.f32 %v1414_v38, %v1111_v56  ;;  %v1057_v22 = vsel %vm1056_vm5, %v1410_v12, %v1053_v61  ;;  %1423 = vrcp.f32 %v2603_v26  ;;  %vm1174_vm11 = vweird.f32 %v2568_v10 }
 0x280   :  { %v1007_v55 = vmul.f32 %v1416_v3, %v1006_v43  ;;  %v1228_v36 = vadd.f32 %v1437_v29, %v1212_v33  ;;  %v1062_v20 = vsel %vm2571_vm13, %v1061_v4, %v1057_v22  ;;  %v1171_v44 = vsub.f32 1.0, %v1170_v54  ;;  %v1422_v59 = vpop.eup %1421  ;;  %vm1176_vm12 = vmor %vm1174_vm11, %vm1175_vm9 }
 0x281   :  { %v1113_v25 = vadd.f32 %v1414_v38, %v1112_v57  ;;  %v1205_v58 = vmul.f32 %v1062_v20, %v2442_v28  ;;  %v1298_v28 = vmul.f32 -1.442695, %v2576_v21  ;;  %v1065_v53 = vmul.f32 %v1422_v59, %v2582_v5  ;;  %v1443_v57 = vld [vmem:[%s2686_s0 + $0x58] sm:$0xff] }
 0x282   :  { %v1008_v31 = vadd.f32 %v1416_v3, %v1007_v55  ;;  %1244 = vst [vmem:[%s2692_s6 + $0x68] sm:$0xff] %v1228_v36  ;;  %v1172_v0 = vmul.f32 %v1420_v47, %v1171_v44  ;;  %vm1179_vm13 = vcmp.eq.f32.partialorder %v1178_v46, 8.507059e+37  ;;  %vm1070_vm14 = vweird.f32 %v1422_v59 }
 0x283   :  { %v1117_v32 = vsel %vm1116_vm8, %v1414_v38, %v1113_v25  ;;  %v1221_v11 = vadd.f32 %v1438_v18, %v1205_v58  ;;  %v1066_v48 = vsub.f32 1.0, %v1065_v53  ;;  %1425 = vpow2.f32 %v1298_v28 }
 0x284   :  { %v1122_v13 = vsel %vm2585_vm0, %v1121_v52, %v1117_v32  ;;  %v1012_v14 = vsel %vm1011_vm10, %v1416_v3, %v1008_v31  ;;  %v1173_v12 = vadd.f32 %v1420_v47, %v1172_v0  ;;  %v1441_v3 = vld [vmem:[%s2686_s0 + $0x70] sm:$0xff]  ;;  %vm1071_vm0 = vmor %vm1069_vm15, %vm1070_vm14  ;;  %vm1074_vm1 = vcmp.eq.f32.partialorder %v1073_v17, 8.507059e+37  ;;  %v1444_v31 = vld [vmem:[%s2686_s0 + $0x78] sm:$0xff] }
 0x285   :  { %v1209_v60 = vmul.f32 %v1122_v13, %v2482_v51  ;;  %v1017_v9 = vsel %vm2593_vm4, %v1016_v39, %v1012_v14  ;;  %1237 = vst [vmem:[%s2692_s6 + $0x30] sm:$0xff] %v1221_v11  ;;  %v1181_v51 = vor.u32 1.1754944e-38, %v1180_v45  ;;  %v1424_v10 = vpop.eup %1423  ;;  %v1067_v30 = vmul.f32 %v1422_v59, %v1066_v48 }
 0x286   :  { %v1202_v63 = vmul.f32 %v1017_v9, %v2486_v62  ;;  %v1177_v4 = vsel %vm1176_vm12, %v1420_v47, %v1173_v12  ;;  %v1075_v62 = vand.u32 2147483648, %v2582_v5  ;;  %v1125_v23 = vmul.f32 %v1424_v10, %v2603_v26 }
 0x287   :  { %v1225_v42 = vadd.f32 %v1439_v16, %v1209_v60  ;;  %v1182_v37 = vsel %vm1179_vm13, %v1181_v51, %v1177_v4  ;;  %v1068_v6 = vadd.f32 %v1422_v59, %v1067_v30  ;;  %v1133_v40 = vand.u32 2147483647, %v2603_v26 }
 0x288   :  { %v1218_v15 = vadd.f32 %v1440_v7, %v1202_v63  ;;  %v1213_v38 = vmul.f32 %v1182_v37, %v2509_v2  ;;  %v1076_v8 = vor.u32 1.1754944e-38, %v1075_v62  ;;  %v1126_v27 = vsub.f32 1.0, %v1125_v23 }
 0x289   :  { %1241 = vst [vmem:[%s2692_s6 + $0x50] sm:$0xff] %v1225_v42  ;;  %v1426_v24 = vpop.eup %1425  ;;  %v1072_v52 = vsel %vm1071_vm0, %v1422_v59, %v1068_v6  ;;  %v1135_v2 = vand.u32 2147483648, %v2603_v26  ;;  %vm1130_vm2 = vweird.f32 %v1424_v10  ;;  %vm1129_vm3 = vweird.f32 %v2603_v26 }
 0x28a   :  { %1234 = vst [vmem:[%s2692_s6 + $0x18] sm:$0xff] %v1218_v15  ;;  %v1229_v41 = vadd.f32 %v1441_v3, %v1213_v38  ;;  %v1077_v5 = vsel %vm1074_vm1, %v1076_v8, %v1072_v52  ;;  %v1127_v50 = vmul.f32 %v1424_v10, %v1126_v27  ;;  %v958_v35 = vadd.f32 1.0, %v1426_v24  ;;  %vm1131_vm4 = vmor %vm1129_vm3, %vm1130_vm2 }
 0x28b   :  { %v1206_v56 = vmul.f32 %v1077_v5, %v2524_v34  ;;  %v1136_v43 = vor.u32 1.1754944e-38, %v1135_v2  ;;  %vm1134_vm5 = vcmp.eq.f32.partialorder %v1133_v40, 8.507059e+37 }
 0x28c   :  { %1245 = vst [vmem:[%s2692_s6 + $0x70] sm:$0xff] %v1229_v41  ;;  %v1128_v49 = vadd.f32 %v1424_v10, %v1127_v50  ;;  %1427 = vrcp.f32 %v958_v35  ;;  %v1195_v54 = vand.u32 2147483648, %v958_v35  ;;  %v1193_v36 = vand.u32 2147483647, %v958_v35 }
 0x28d   :  { %v1222_v61 = vadd.f32 %v1442_v19, %v1206_v56  ;;  %vm1189_vm7 = vweird.f32 %v958_v35 }
 0x28e   :  { %v1132_v39 = vsel %vm1131_vm4, %v1424_v10, %v1128_v49  ;;  %vm1194_vm10 = vcmp.eq.f32.partialorder %v1193_v36, 8.507059e+37 }
 0x28f   :  { %1238 = vst [vmem:[%s2692_s6 + $0x38] sm:$0xff] %v1222_v61  ;;  %v1137_v47 = vsel %vm1134_vm5, %v1136_v43, %v1132_v39 }
 0x290   :  { %v1210_v34 = vmul.f32 %v1137_v47, %v2539_v1  ;;  %v1196_v1 = vor.u32 1.1754944e-38, %v1195_v54 }
 0x292   :  { %v1428_v33 = vpop.eup %1427  ;;  %v1226_v26 = vadd.f32 %v1443_v57, %v1210_v34 }
 0x293   :  { %v1185_v22 = vmul.f32 %v1428_v33, %v958_v35  ;;  %vm1190_vm6 = vweird.f32 %v1428_v33 }
 0x294   :  { %1242 = vst [vmem:[%s2692_s6 + $0x58] sm:$0xff] %v1226_v26  ;;  %vm1191_vm8 = vmor %vm1189_vm7, %vm1190_vm6 }
 0x295   :  { %v1186_v55 = vsub.f32 1.0, %v1185_v22 }
 0x297   :  { %v1187_v29 = vmul.f32 %v1428_v33, %v1186_v55 }
 0x299   :  { %v1188_v20 = vadd.f32 %v1428_v33, %v1187_v29 }
 0x29b   :  { %v1192_v25 = vsel %vm1191_vm8, %v1428_v33, %v1188_v20 }
 0x29c   :  { %v1197_v46 = vsel %vm1194_vm10, %v1196_v1, %v1192_v25 }
 0x29d   :  { %v1214_v58 = vmul.f32 %v1197_v46, %v2576_v21 }
 0x29f   :  { %v1230_v44 = vadd.f32 %v1444_v31, %v1214_v58 }
 0x2a1   :  { %1246 = vst [vmem:[%s2692_s6 + $0x78] sm:$0xff] %v1230_v44 }

</bundles_post_ra>
